<compile_context>
chip_gen: v7x
topology: tpu7x:2x2x1
jax: 0.10.0
libtpu: 0.0.40
codegen_flags: <defaults>
</compile_context>

<pallas_src>
import functools

import jax
import jax.numpy as jnp
from jax.experimental import pallas as pl
from jax.experimental.pallas import tpu as pltpu

EPS = 1e-5
LANES = 128


def _round_up(x, m):
    return ((x + m - 1) // m) * m


def conv_bn_relu(x_nchw, w_oihw, bias, gamma, beta, *, stride=1, padding=1):
    """Forward of ConvBNRelu. x_nchw: (N, Cin, H, W). Returns (N, Cout, Ho, Wo)."""
    N, Cin, H, W = x_nchw.shape
    Cout, _, KH, KW = w_oihw.shape
    sh = sw = stride
    ph = pw = padding
    Ho = (H + 2 * ph - KH) // sh + 1
    Wo = (W + 2 * pw - KW) // sw + 1
    HoWo = Ho * Wo
    K = KH * KW * Cin
    M = N * HoWo
    Cpad = _round_up(Cout, LANES)            # lane-dense channel dimension

    # ---- glue: NCHW -> NHWC, spatial zero-pad; weights -> (K, Cpad) ----------------
    x_nhwc = jnp.transpose(x_nchw, (0, 2, 3, 1)).astype(jnp.float32)
    xp = jnp.pad(x_nhwc, ((0, 0), (ph, ph), (pw, pw), (0, 0)))
    Hp, Wp = H + 2 * ph, W + 2 * pw

    # weight (Cout, Cin, KH, KW) -> (KH, KW, Cin, Cout) -> (K, Cout) -> pad lanes
    w_mat = jnp.transpose(w_oihw, (2, 3, 1, 0)).reshape(K, Cout).astype(jnp.float32)
    w_mat = jnp.pad(w_mat, ((0, 0), (0, Cpad - Cout)))
    b_row = jnp.pad(bias.reshape(1, Cout).astype(jnp.float32),
                    ((0, 0), (0, Cpad - Cout)))
    g_row = jnp.pad(gamma.reshape(1, Cout).astype(jnp.float32),
                    ((0, 0), (0, Cpad - Cout)))
    be_row = jnp.pad(beta.reshape(1, Cout).astype(jnp.float32),
                     ((0, 0), (0, Cpad - Cout)))

    # ---- kernel 1: per-image conv (in-VMEM patch gather) + bias + partial stats ----
    def conv_kernel(x_ref, w_ref, b_ref, o_ref, psum_ref, psq_ref):
        xv = x_ref[0]                                          # (Hp, Wp, Cin)
        taps = []
        for dh in range(KH):
            for dw in range(KW):
                t = xv[dh:dh + (Ho - 1) * sh + 1:sh,
                       dw:dw + (Wo - 1) * sw + 1:sw, :]        # (Ho, Wo, Cin)
                taps.append(t.reshape(HoWo, Cin))
        patches = jnp.concatenate(taps, axis=-1)               # (HoWo, K) in VMEM
        acc = jnp.dot(patches, w_ref[...],
                      preferred_element_type=jnp.float32) + b_ref[...]
        o_ref[0] = acc                                         # (HoWo, Cpad), lane-dense
        # per-image partial BN statistics (no padded rows -> no masking needed)
        psum_ref[0] = jnp.sum(acc, axis=0, keepdims=True)
        psq_ref[0] = jnp.sum(acc * acc, axis=0, keepdims=True)

    conv_out, psum, psq = pl.pallas_call(
        conv_kernel,
        out_shape=(
            jax.ShapeDtypeStruct((N, HoWo, Cpad), jnp.float32),
            jax.ShapeDtypeStruct((N, 1, Cpad), jnp.float32),
            jax.ShapeDtypeStruct((N, 1, Cpad), jnp.float32),
        ),
        grid=(N,),
        in_specs=[
            pl.BlockSpec((1, Hp, Wp, Cin), lambda i: (i, 0, 0, 0)),
            pl.BlockSpec((K, Cpad), lambda i: (0, 0)),
            pl.BlockSpec((1, Cpad), lambda i: (0, 0)),
        ],
        out_specs=(
            pl.BlockSpec((1, HoWo, Cpad), lambda i: (i, 0, 0)),
            pl.BlockSpec((1, 1, Cpad), lambda i: (i, 0, 0)),
            pl.BlockSpec((1, 1, Cpad), lambda i: (i, 0, 0)),
        ),
        compiler_params=pltpu.CompilerParams(
            dimension_semantics=("parallel",)),
    )(xp, w_mat, b_row)

    # ---- tiny (1, Cpad) stat reduction; fold BN into per-channel scale/shift -------
    ch_sum = jnp.sum(psum, axis=0)                      # (1, Cpad)
    ch_sq = jnp.sum(psq, axis=0)                        # (1, Cpad)
    mean = ch_sum / jnp.float32(M)
    var = ch_sq / jnp.float32(M) - mean * mean          # biased batch variance
    scale = g_row * jax.lax.rsqrt(var + jnp.float32(EPS))
    shift = be_row - mean * scale
    scale3 = scale.reshape(1, 1, Cpad)
    shift3 = shift.reshape(1, 1, Cpad)

    # ---- kernel 2: fused BatchNorm (precomputed scale/shift) + ReLU ---------------
    def bn_relu_kernel(y_ref, sc_ref, sf_ref, o_ref):
        o_ref[...] = jnp.maximum(y_ref[...] * sc_ref[...] + sf_ref[...], 0.0)

    out_flat = pl.pallas_call(
        bn_relu_kernel,
        out_shape=jax.ShapeDtypeStruct((N, HoWo, Cpad), jnp.float32),
        grid=(N,),
        in_specs=[
            pl.BlockSpec((1, HoWo, Cpad), lambda i: (i, 0, 0)),
            pl.BlockSpec((1, 1, Cpad), lambda i: (0, 0, 0)),
            pl.BlockSpec((1, 1, Cpad), lambda i: (0, 0, 0)),
        ],
        out_specs=pl.BlockSpec((1, HoWo, Cpad), lambda i: (i, 0, 0)),
        compiler_params=pltpu.CompilerParams(
            dimension_semantics=("parallel",)),
    )(conv_out, scale3, shift3)

    out = out_flat[:, :, :Cout].reshape(N, Ho, Wo, Cout)
    return jnp.transpose(out, (0, 3, 1, 2))              # back to NCHW


def ref_forward(x, w, b, gamma, beta, *, stride=1, padding=1):
    """Pure-JAX reference (matches PyTorch training-mode BN forward)."""
    y = jax.lax.conv_general_dilated(
        x, w, (stride, stride), ((padding, padding), (padding, padding)),
        dimension_numbers=("NCHW", "OIHW", "NCHW"))
    y = y + b[None, :, None, None]
    mean = y.mean(axis=(0, 2, 3))
    var = ((y - mean[None, :, None, None]) ** 2).mean(axis=(0, 2, 3))
    yn = (y - mean[None, :, None, None]) * jax.lax.rsqrt(
        var[None, :, None, None] + EPS)
    yn = yn * gamma[None, :, None, None] + beta[None, :, None, None]
    return jnp.maximum(yn, 0.0)


if __name__ == "__main__":
    # ConvBNRelu(channelx=(4, 8), stridex=1, kernelx=3, paddingx=1)
    N, Cin, H, W = 2, 4, 16, 16
    Cout, KH, KW = 8, 3, 3
    stride, padding = 1, 1

    key = jax.random.PRNGKey(0)
    kx, kw, kb, kg, kbe = jax.random.split(key, 5)
    x = jax.random.normal(kx, (N, Cin, H, W), dtype=jnp.float32)
    w = jax.random.normal(kw, (Cout, Cin, KH, KW), dtype=jnp.float32) * 0.1
    bias = jax.random.normal(kb, (Cout,), dtype=jnp.float32) * 0.1
    gamma = 1.0 + 0.1 * jax.random.normal(kg, (Cout,), dtype=jnp.float32)
    beta = 0.1 * jax.random.normal(kbe, (Cout,), dtype=jnp.float32)

    fn = functools.partial(conv_bn_relu, stride=stride, padding=padding)
    y = jax.jit(fn)(x, w, bias, gamma, beta)
    jax.block_until_ready(y)

    y_ref = ref_forward(x, w, bias, gamma, beta, stride=stride, padding=padding)
    assert y.shape == (N, Cout, H, W)
    assert jnp.allclose(y, y_ref, atol=1e-4, rtol=1e-3), "mismatch vs reference"

    print("KERNEL_OK")
</pallas_src>

<mosaic_0001>
module attributes {stable_mosaic.version = 11 : i64} {
  func.func @conv_kernel(%arg0: i32, %arg1: memref<1x18x18x4xf32, #tpu.memory_space<vmem>>, %arg2: memref<36x128xf32, #tpu.memory_space<vmem>>, %arg3: memref<1x128xf32, #tpu.memory_space<vmem>>, %arg4: memref<1x256x128xf32, #tpu.memory_space<vmem>>, %arg5: memref<1x1x128xf32, #tpu.memory_space<vmem>>, %arg6: memref<1x1x128xf32, #tpu.memory_space<vmem>>) attributes {dimension_semantics = [#tpu.dimension_semantics<parallel>], iteration_bounds = array<i64: 2>, scalar_prefetch = 0 : i64, scratch_operands = 0 : i64, tpu.core_type = #tpu.core_type<tc>, window_params = [{transform_indices = @transform_0, window_bounds = array<i64: 1, 18, 18, 4>}, {pipeline_mode = #tpu.pipeline_mode<synchronous>, transform_indices = @transform_1, window_bounds = array<i64: 36, 128>}, {pipeline_mode = #tpu.pipeline_mode<synchronous>, transform_indices = @transform_2, window_bounds = array<i64: 1, 128>}, {transform_indices = @transform_3, window_bounds = array<i64: 1, 256, 128>}, {transform_indices = @transform_4, window_bounds = array<i64: 1, 1, 128>}, {transform_indices = @transform_5, window_bounds = array<i64: 1, 1, 128>}]} {
    %c0 = arith.constant 0 : index
    %c0_0 = arith.constant 0 : index
    %c0_1 = arith.constant 0 : index
    %c0_2 = arith.constant 0 : index
    %0 = vector.load %arg1[%c0, %c0_0, %c0_1, %c0_2] : memref<1x18x18x4xf32, #tpu.memory_space<vmem>>, vector<1x18x18x4xf32>
    %1 = vector.shape_cast %0 : vector<1x18x18x4xf32> to vector<18x18x4xf32>
    %2 = vector.extract_strided_slice %1 {offsets = [0, 0, 0], sizes = [16, 16, 4], strides = [1, 1, 1]} : vector<18x18x4xf32> to vector<16x16x4xf32>
    %3 = vector.shape_cast %2 : vector<16x16x4xf32> to vector<256x4xf32>
    %4 = vector.extract_strided_slice %1 {offsets = [0, 1, 0], sizes = [16, 16, 4], strides = [1, 1, 1]} : vector<18x18x4xf32> to vector<16x16x4xf32>
    %5 = vector.shape_cast %4 : vector<16x16x4xf32> to vector<256x4xf32>
    %6 = vector.extract_strided_slice %1 {offsets = [0, 2, 0], sizes = [16, 16, 4], strides = [1, 1, 1]} : vector<18x18x4xf32> to vector<16x16x4xf32>
    %7 = vector.shape_cast %6 : vector<16x16x4xf32> to vector<256x4xf32>
    %8 = vector.extract_strided_slice %1 {offsets = [1, 0, 0], sizes = [16, 16, 4], strides = [1, 1, 1]} : vector<18x18x4xf32> to vector<16x16x4xf32>
    %9 = vector.shape_cast %8 : vector<16x16x4xf32> to vector<256x4xf32>
    %10 = vector.extract_strided_slice %1 {offsets = [1, 1, 0], sizes = [16, 16, 4], strides = [1, 1, 1]} : vector<18x18x4xf32> to vector<16x16x4xf32>
    %11 = vector.shape_cast %10 : vector<16x16x4xf32> to vector<256x4xf32>
    %12 = vector.extract_strided_slice %1 {offsets = [1, 2, 0], sizes = [16, 16, 4], strides = [1, 1, 1]} : vector<18x18x4xf32> to vector<16x16x4xf32>
    %13 = vector.shape_cast %12 : vector<16x16x4xf32> to vector<256x4xf32>
    %14 = vector.extract_strided_slice %1 {offsets = [2, 0, 0], sizes = [16, 16, 4], strides = [1, 1, 1]} : vector<18x18x4xf32> to vector<16x16x4xf32>
    %15 = vector.shape_cast %14 : vector<16x16x4xf32> to vector<256x4xf32>
    %16 = vector.extract_strided_slice %1 {offsets = [2, 1, 0], sizes = [16, 16, 4], strides = [1, 1, 1]} : vector<18x18x4xf32> to vector<16x16x4xf32>
    %17 = vector.shape_cast %16 : vector<16x16x4xf32> to vector<256x4xf32>
    %18 = vector.extract_strided_slice %1 {offsets = [2, 2, 0], sizes = [16, 16, 4], strides = [1, 1, 1]} : vector<18x18x4xf32> to vector<16x16x4xf32>
    %19 = vector.shape_cast %18 : vector<16x16x4xf32> to vector<256x4xf32>
    %20 = tpu.concatenate %3, %5, %7, %9, %11, %13, %15, %17, %19 in 1 : vector<256x4xf32>, vector<256x4xf32>, vector<256x4xf32>, vector<256x4xf32>, vector<256x4xf32>, vector<256x4xf32>, vector<256x4xf32>, vector<256x4xf32>, vector<256x4xf32> -> vector<256x36xf32>
    %c0_3 = arith.constant 0 : index
    %c0_4 = arith.constant 0 : index
    %21 = vector.load %arg2[%c0_3, %c0_4] : memref<36x128xf32, #tpu.memory_space<vmem>>, vector<36x128xf32>
    %cst = arith.constant dense<0.000000e+00> : vector<256x128xf32>
    %22 = tpu.matmul %20, %21, %cst {dimension_numbers = #tpu.dot_dimension_numbers<[1], [0], [0], [1], [0, 0, 1, 1], [], []>} : vector<256x36xf32>, vector<36x128xf32>, vector<256x128xf32> -> vector<256x128xf32>
    %c0_5 = arith.constant 0 : index
    %c0_6 = arith.constant 0 : index
    %23 = vector.load %arg3[%c0_5, %c0_6] : memref<1x128xf32, #tpu.memory_space<vmem>>, vector<1x128xf32>
    %24 = vector.broadcast %23 : vector<1x128xf32> to vector<256x128xf32>
    %25 = arith.addf %22, %24 : vector<256x128xf32>
    %c0_7 = arith.constant 0 : index
    %c0_8 = arith.constant 0 : index
    %c0_9 = arith.constant 0 : index
    %26 = vector.load %arg4[%c0_7, %c0_8, %c0_9] : memref<1x256x128xf32, #tpu.memory_space<vmem>>, vector<1x256x128xf32>
    %27 = vector.shape_cast %26 : vector<1x256x128xf32> to vector<256x128xf32>
    %28 = vector.shape_cast %25 : vector<256x128xf32> to vector<1x256x128xf32>
    tpu.vector_store %arg4[%c0_7, %c0_8, %c0_9], %28 {strides = array<i32>} : memref<1x256x128xf32, #tpu.memory_space<vmem>>, vector<1x256x128xf32>,
    %cst_10 = arith.constant dense<0.000000e+00> : vector<128xf32>
    %29 = vector.multi_reduction <add>, %25, %cst_10 [0] : vector<256x128xf32> to vector<128xf32>
    %30 = vector.shape_cast %29 : vector<128xf32> to vector<1x128xf32>
    %c0_11 = arith.constant 0 : index
    %c0_12 = arith.constant 0 : index
    %c0_13 = arith.constant 0 : index
    %31 = vector.load %arg5[%c0_11, %c0_12, %c0_13] : memref<1x1x128xf32, #tpu.memory_space<vmem>>, vector<1x1x128xf32>
    %32 = vector.shape_cast %31 : vector<1x1x128xf32> to vector<1x128xf32>
    %33 = vector.shape_cast %30 : vector<1x128xf32> to vector<1x1x128xf32>
    tpu.vector_store %arg5[%c0_11, %c0_12, %c0_13], %33 {strides = array<i32>} : memref<1x1x128xf32, #tpu.memory_space<vmem>>, vector<1x1x128xf32>,
    %34 = arith.mulf %25, %25 : vector<256x128xf32>
    %cst_14 = arith.constant dense<0.000000e+00> : vector<128xf32>
    %35 = vector.multi_reduction <add>, %34, %cst_14 [0] : vector<256x128xf32> to vector<128xf32>
    %36 = vector.shape_cast %35 : vector<128xf32> to vector<1x128xf32>
    %c0_15 = arith.constant 0 : index
    %c0_16 = arith.constant 0 : index
    %c0_17 = arith.constant 0 : index
    %37 = vector.load %arg6[%c0_15, %c0_16, %c0_17] : memref<1x1x128xf32, #tpu.memory_space<vmem>>, vector<1x1x128xf32>
    %38 = vector.shape_cast %37 : vector<1x1x128xf32> to vector<1x128xf32>
    %39 = vector.shape_cast %36 : vector<1x128xf32> to vector<1x1x128xf32>
    tpu.vector_store %arg6[%c0_15, %c0_16, %c0_17], %39 {strides = array<i32>} : memref<1x1x128xf32, #tpu.memory_space<vmem>>, vector<1x1x128xf32>,
    return
  }
  func.func @transform_0(%arg0: i32) -> (i32, i32, i32, i32) {
    %c0_i32 = arith.constant 0 : i32
    %c0_i32_0 = arith.constant 0 : i32
    %c0_i32_1 = arith.constant 0 : i32
    %c0_i32_2 = arith.constant 0 : i32
    return %arg0, %c0_i32, %c0_i32_0, %c0_i32_1 : i32, i32, i32, i32
  }
  func.func @transform_1(%arg0: i32) -> (i32, i32) {
    %c0_i32 = arith.constant 0 : i32
    %c0_i32_0 = arith.constant 0 : i32
    %c0_i32_1 = arith.constant 0 : i32
    return %c0_i32, %c0_i32_0 : i32, i32
  }
  func.func @transform_2(%arg0: i32) -> (i32, i32) {
    %c0_i32 = arith.constant 0 : i32
    %c0_i32_0 = arith.constant 0 : i32
    %c0_i32_1 = arith.constant 0 : i32
    return %c0_i32, %c0_i32_0 : i32, i32
  }
  func.func @transform_3(%arg0: i32) -> (i32, i32, i32) {
    %c0_i32 = arith.constant 0 : i32
    %c0_i32_0 = arith.constant 0 : i32
    %c0_i32_1 = arith.constant 0 : i32
    return %arg0, %c0_i32, %c0_i32_0 : i32, i32, i32
  }
  func.func @transform_4(%arg0: i32) -> (i32, i32, i32) {
    %c0_i32 = arith.constant 0 : i32
    %c0_i32_0 = arith.constant 0 : i32
    %c0_i32_1 = arith.constant 0 : i32
    return %arg0, %c0_i32, %c0_i32_0 : i32, i32, i32
  }
  func.func @transform_5(%arg0: i32) -> (i32, i32, i32) {
    %c0_i32 = arith.constant 0 : i32
    %c0_i32_0 = arith.constant 0 : i32
    %c0_i32_1 = arith.constant 0 : i32
    return %arg0, %c0_i32, %c0_i32_0 : i32, i32, i32
  }
}

module attributes {stable_mosaic.version = 11 : i64} {
  func.func @bn_relu_kernel(%arg0: i32, %arg1: memref<1x256x128xf32, #tpu.memory_space<vmem>>, %arg2: memref<1x1x128xf32, #tpu.memory_space<vmem>>, %arg3: memref<1x1x128xf32, #tpu.memory_space<vmem>>, %arg4: memref<1x256x128xf32, #tpu.memory_space<vmem>>) attributes {dimension_semantics = [#tpu.dimension_semantics<parallel>], iteration_bounds = array<i64: 2>, scalar_prefetch = 0 : i64, scratch_operands = 0 : i64, tpu.core_type = #tpu.core_type<tc>, window_params = [{transform_indices = @transform_0, window_bounds = array<i64: 1, 256, 128>}, {pipeline_mode = #tpu.pipeline_mode<synchronous>, transform_indices = @transform_1, window_bounds = array<i64: 1, 1, 128>}, {pipeline_mode = #tpu.pipeline_mode<synchronous>, transform_indices = @transform_2, window_bounds = array<i64: 1, 1, 128>}, {transform_indices = @transform_3, window_bounds = array<i64: 1, 256, 128>}]} {
    %c0 = arith.constant 0 : index
    %c0_0 = arith.constant 0 : index
    %c0_1 = arith.constant 0 : index
    %0 = vector.load %arg1[%c0, %c0_0, %c0_1] : memref<1x256x128xf32, #tpu.memory_space<vmem>>, vector<1x256x128xf32>
    %c0_2 = arith.constant 0 : index
    %c0_3 = arith.constant 0 : index
    %c0_4 = arith.constant 0 : index
    %1 = vector.load %arg2[%c0_2, %c0_3, %c0_4] : memref<1x1x128xf32, #tpu.memory_space<vmem>>, vector<1x1x128xf32>
    %2 = vector.broadcast %1 : vector<1x1x128xf32> to vector<1x256x128xf32>
    %3 = arith.mulf %0, %2 : vector<1x256x128xf32>
    %c0_5 = arith.constant 0 : index
    %c0_6 = arith.constant 0 : index
    %c0_7 = arith.constant 0 : index
    %4 = vector.load %arg3[%c0_5, %c0_6, %c0_7] : memref<1x1x128xf32, #tpu.memory_space<vmem>>, vector<1x1x128xf32>
    %5 = vector.broadcast %4 : vector<1x1x128xf32> to vector<1x256x128xf32>
    %6 = arith.addf %3, %5 : vector<1x256x128xf32>
    %cst = arith.constant 0.000000e+00 : f32
    %7 = vector.broadcast %cst : f32 to vector<1x256x128xf32>
    %8 = arith.maximumf %6, %7 : vector<1x256x128xf32>
    %c0_8 = arith.constant 0 : index
    %c0_9 = arith.constant 0 : index
    %c0_10 = arith.constant 0 : index
    %9 = vector.load %arg4[%c0_8, %c0_9, %c0_10] : memref<1x256x128xf32, #tpu.memory_space<vmem>>, vector<1x256x128xf32>
    tpu.vector_store %arg4[%c0_8, %c0_9, %c0_10], %8 {strides = array<i32>} : memref<1x256x128xf32, #tpu.memory_space<vmem>>, vector<1x256x128xf32>,
    return
  }
  func.func @transform_0(%arg0: i32) -> (i32, i32, i32) {
    %c0_i32 = arith.constant 0 : i32
    %c0_i32_0 = arith.constant 0 : i32
    %c0_i32_1 = arith.constant 0 : i32
    return %arg0, %c0_i32, %c0_i32_0 : i32, i32, i32
  }
  func.func @transform_1(%arg0: i32) -> (i32, i32, i32) {
    %c0_i32 = arith.constant 0 : i32
    %c0_i32_0 = arith.constant 0 : i32
    %c0_i32_1 = arith.constant 0 : i32
    %c0_i32_2 = arith.constant 0 : i32
    return %c0_i32, %c0_i32_0, %c0_i32_1 : i32, i32, i32
  }
  func.func @transform_2(%arg0: i32) -> (i32, i32, i32) {
    %c0_i32 = arith.constant 0 : i32
    %c0_i32_0 = arith.constant 0 : i32
    %c0_i32_1 = arith.constant 0 : i32
    %c0_i32_2 = arith.constant 0 : i32
    return %c0_i32, %c0_i32_0, %c0_i32_1 : i32, i32, i32
  }
  func.func @transform_3(%arg0: i32) -> (i32, i32, i32) {
    %c0_i32 = arith.constant 0 : i32
    %c0_i32_0 = arith.constant 0 : i32
    %c0_i32_1 = arith.constant 0 : i32
    return %arg0, %c0_i32, %c0_i32_0 : i32, i32, i32
  }
}

</mosaic_0001>

<bundles_post_ra>
// kernel: conv_bn_relu.3
= control target key start
LH: loop header
LB: loop body
LE: loop exit
PB: predicated region body
PF: predicated region fallthrough
CT: control target
= control target key end

     0   :  { %s451_s12 = smov 0   ;;  %s610_s0 = inlined_call_operand.vmem [shape: f32[2,256,128], index: 0, kind: input, shape index: {}]   ;;  %s611_s1 = inlined_call_operand.vmem [shape: f32[1,1,128], index: 1, kind: input, shape index: {}]   ;;  %s612_s2 = inlined_call_operand.vmem [shape: f32[1,1,128], index: 2, kind: input, shape index: {}]   ;;  %s613_s3 = inlined_call_operand.vmem [shape: f32[2,256,128], index: 3, kind: output, shape index: {}]  }
   0x1 LB: > { %s400_s13 = sadd.s32 4294967295, %s429_s12   ;;  %p404_p0 = scmp.ge.s32.totalorder %s429_s12, 1  ;;  %s429_s12 = sphi %s451_s12, %s13_s12  }
   0x2   : > { %p137_p1 = scmp.lt.s32.totalorder %s429_s12, 3 }
   0x4   : > { %p138_p2 = pnand %p404_p0, %p137_p1 }
   0x5   : > { %p161_p3 = scmp.lt.s32.totalorder (!%p138_p2), %s400_s13, 1  ;;  %v462_v0 = vld [vmem:[%s611_s1] ss:$0 sm:$0xff] (!%p138_p2) }
   0x6   : > { %141 = sbr.rel (%p138_p2) target bundleno = 46 (0x2e), region = 32  ;;  %v472_v1 = vld [vmem:[%s612_s2] ss:$0 sm:$0xff] (!%p138_p2) }
   0xd   : > { %s615_s13 = smov (!%p161_p3, %s400_s13), 1 }
   0xe   : > { %s413_s14 = sshll.u32 %s615_s13, 8 }
   0xf   : > { %s467_s19 = scalar_lea.vmem %s610_s0, %s413_s14  ;;  %s495_s24 = scalar_lea.vmem %s613_s3, %s413_s14 }
  0x10   : > { %v171_v2 = vld [vmem:[%s467_s19] sm:$0xff]  ;;  %v172_v3 = vld [vmem:[%s467_s19 + $0x8] sm:$0xff]  ;;  %v173_v4 = vld [vmem:[%s467_s19 + $0x10] sm:$0xff] }
  0x11   : > { %v210_v5 = vmul.f32 %v462_v0, %v171_v2  ;;  %v211_v6 = vmul.f32 %v462_v0, %v172_v3  ;;  %v212_v7 = vmul.f32 %v462_v0, %v173_v4  ;;  %v174_v8 = vld [vmem:[%s467_s19 + $0x18] sm:$0xff]  ;;  %v175_v9 = vld [vmem:[%s467_s19 + $0x20] sm:$0xff]  ;;  %v176_v10 = vld [vmem:[%s467_s19 + $0x28] sm:$0xff] }
  0x12   : > { %v213_v11 = vmul.f32 %v462_v0, %v174_v8  ;;  %v214_v12 = vmul.f32 %v462_v0, %v175_v9  ;;  %v215_v13 = vmul.f32 %v462_v0, %v176_v10  ;;  %v177_v14 = vld [vmem:[%s467_s19 + $0x30] sm:$0xff]  ;;  %v178_v15 = vld [vmem:[%s467_s19 + $0x38] sm:$0xff]  ;;  %v179_v24 = vld [vmem:[%s467_s19 + $0x40] sm:$0xff] }
  0x13   : > { %v249_v16 = vadd.f32 %v472_v1, %v210_v5  ;;  %v250_v17 = vadd.f32 %v472_v1, %v211_v6  ;;  %v251_v18 = vadd.f32 %v472_v1, %v212_v7  ;;  %v216_v19 = vmul.f32 %v462_v0, %v177_v14  ;;  %v180_v25 = vld [vmem:[%s467_s19 + $0x48] sm:$0xff]  ;;  %v181_v26 = vld [vmem:[%s467_s19 + $0x50] sm:$0xff]  ;;  %v182_v31 = vld [vmem:[%s467_s19 + $0x58] sm:$0xff] }
  0x14   : > { %v252_v20 = vadd.f32 %v472_v1, %v213_v11  ;;  %v253_v21 = vadd.f32 %v472_v1, %v214_v12  ;;  %v254_v22 = vadd.f32 %v472_v1, %v215_v13  ;;  %v217_v23 = vmul.f32 %v462_v0, %v178_v15  ;;  %v183_v32 = vld [vmem:[%s467_s19 + $0x60] sm:$0xff]  ;;  %v184_v33 = vld [vmem:[%s467_s19 + $0x68] sm:$0xff]  ;;  %v185_v38 = vld [vmem:[%s467_s19 + $0x70] sm:$0xff] }
  0x15   : > { %v281_v27 = vmax.f32 %v249_v16, 0.0  ;;  %v282_v28 = vmax.f32 %v250_v17, 0.0  ;;  %v283_v29 = vmax.f32 %v251_v18, 0.0  ;;  %v255_v30 = vadd.f32 %v472_v1, %v216_v19  ;;  %v186_v43 = vld [vmem:[%s467_s19 + $0x78] sm:$0xff]  ;;  %v187_v56 = vld [vmem:[%s467_s19 + $0x80] sm:$0xff]  ;;  %v188_v57 = vld [vmem:[%s467_s19 + $0x88] sm:$0xff] }
  0x16   : > { %v284_v34 = vmax.f32 %v252_v20, 0.0  ;;  %v285_v35 = vmax.f32 %v253_v21, 0.0  ;;  %v286_v36 = vmax.f32 %v254_v22, 0.0  ;;  %v256_v37 = vadd.f32 %v472_v1, %v217_v23  ;;  %v189_v58 = vld [vmem:[%s467_s19 + $0x90] sm:$0xff]  ;;  %v190_v63 = vld [vmem:[%s467_s19 + $0x98] sm:$0xff]  ;;  %v191_v2 = vld [vmem:[%s467_s19 + $0xa0] sm:$0xff] }
  0x17   : > { %313 = vst [vmem:[%s495_s24] sm:$0xff] %v281_v27  ;;  %314 = vst [vmem:[%s495_s24 + $0x8] sm:$0xff] %v282_v28  ;;  %v287_v39 = vmax.f32 %v255_v30, 0.0  ;;  %v218_v40 = vmul.f32 %v462_v0, %v179_v24  ;;  %v219_v41 = vmul.f32 %v462_v0, %v180_v25  ;;  %v220_v42 = vmul.f32 %v462_v0, %v181_v26  ;;  %v192_v3 = vld [vmem:[%s467_s19 + $0xa8] sm:$0xff]  ;;  %v193_v8 = vld [vmem:[%s467_s19 + $0xb0] sm:$0xff] }
  0x18   : > { %315 = vst [vmem:[%s495_s24 + $0x10] sm:$0xff] %v283_v29  ;;  %316 = vst [vmem:[%s495_s24 + $0x18] sm:$0xff] %v284_v34  ;;  %v288_v44 = vmax.f32 %v256_v37, 0.0  ;;  %v221_v45 = vmul.f32 %v462_v0, %v182_v31  ;;  %v222_v46 = vmul.f32 %v462_v0, %v183_v32  ;;  %v223_v47 = vmul.f32 %v462_v0, %v184_v33  ;;  %v194_v13 = vld [vmem:[%s467_s19 + $0xb8] sm:$0xff]  ;;  %v195_v26 = vld [vmem:[%s467_s19 + $0xc0] sm:$0xff] }
  0x19   : > { %317 = vst [vmem:[%s495_s24 + $0x20] sm:$0xff] %v285_v35  ;;  %318 = vst [vmem:[%s495_s24 + $0x28] sm:$0xff] %v286_v36  ;;  %v257_v48 = vadd.f32 %v472_v1, %v218_v40  ;;  %v258_v49 = vadd.f32 %v472_v1, %v219_v41  ;;  %v259_v50 = vadd.f32 %v472_v1, %v220_v42  ;;  %v196_v27 = vld [vmem:[%s467_s19 + $0xc8] sm:$0xff]  ;;  %v197_v28 = vld [vmem:[%s467_s19 + $0xd0] sm:$0xff] }
  0x1a   : > { %319 = vst [vmem:[%s495_s24 + $0x30] sm:$0xff] %v287_v39  ;;  %v224_v51 = vmul.f32 %v462_v0, %v185_v38  ;;  %320 = vst [vmem:[%s495_s24 + $0x38] sm:$0xff] %v288_v44  ;;  %v260_v52 = vadd.f32 %v472_v1, %v221_v45  ;;  %v261_v53 = vadd.f32 %v472_v1, %v222_v46  ;;  %v198_v33 = vld [vmem:[%s467_s19 + $0xd8] sm:$0xff]  ;;  %v199_v34 = vld [vmem:[%s467_s19 + $0xe0] sm:$0xff] }
  0x1b   : > { %v262_v54 = vadd.f32 %v472_v1, %v223_v47  ;;  %v225_v55 = vmul.f32 %v462_v0, %v186_v43  ;;  %v289_v59 = vmax.f32 %v257_v48, 0.0  ;;  %v290_v60 = vmax.f32 %v258_v49, 0.0  ;;  %v200_v35 = vld [vmem:[%s467_s19 + $0xe8] sm:$0xff]  ;;  %v201_v40 = vld [vmem:[%s467_s19 + $0xf0] sm:$0xff]  ;;  %v202_v45 = vld [vmem:[%s467_s19 + $0xf8] sm:$0xff] }
  0x1c   : > { %v291_v61 = vmax.f32 %v259_v50, 0.0  ;;  %v263_v62 = vadd.f32 %v472_v1, %v224_v51  ;;  %v292_v4 = vmax.f32 %v260_v52, 0.0  ;;  %v293_v5 = vmax.f32 %v261_v53, 0.0 }
  0x1d   : > { %v294_v6 = vmax.f32 %v262_v54, 0.0  ;;  %v264_v7 = vadd.f32 %v472_v1, %v225_v55  ;;  %321 = vst [vmem:[%s495_s24 + $0x40] sm:$0xff] %v289_v59  ;;  %322 = vst [vmem:[%s495_s24 + $0x48] sm:$0xff] %v290_v60  ;;  %v226_v10 = vmul.f32 %v462_v0, %v187_v56  ;;  %v227_v11 = vmul.f32 %v462_v0, %v188_v57 }
  0x1e   : > { %323 = vst [vmem:[%s495_s24 + $0x50] sm:$0xff] %v291_v61  ;;  %v295_v9 = vmax.f32 %v263_v62, 0.0  ;;  %v228_v12 = vmul.f32 %v462_v0, %v189_v58  ;;  %324 = vst [vmem:[%s495_s24 + $0x58] sm:$0xff] %v292_v4  ;;  %v229_v15 = vmul.f32 %v462_v0, %v190_v63  ;;  %v230_v16 = vmul.f32 %v462_v0, %v191_v2 }
  0x1f   : > { %325 = vst [vmem:[%s495_s24 + $0x60] sm:$0xff] %v293_v5  ;;  %326 = vst [vmem:[%s495_s24 + $0x68] sm:$0xff] %v294_v6  ;;  %v296_v14 = vmax.f32 %v264_v7, 0.0  ;;  %v231_v17 = vmul.f32 %v462_v0, %v192_v3  ;;  %v265_v18 = vadd.f32 %v472_v1, %v226_v10  ;;  %v266_v19 = vadd.f32 %v472_v1, %v227_v11 }
  0x20   : > { %327 = vst [vmem:[%s495_s24 + $0x70] sm:$0xff] %v295_v9  ;;  %v267_v20 = vadd.f32 %v472_v1, %v228_v12  ;;  %v232_v21 = vmul.f32 %v462_v0, %v193_v8  ;;  %v268_v22 = vadd.f32 %v472_v1, %v229_v15  ;;  %v269_v23 = vadd.f32 %v472_v1, %v230_v16 }
  0x21   : > { %328 = vst [vmem:[%s495_s24 + $0x78] sm:$0xff] %v296_v14  ;;  %v270_v24 = vadd.f32 %v472_v1, %v231_v17  ;;  %v233_v25 = vmul.f32 %v462_v0, %v194_v13  ;;  %v297_v29 = vmax.f32 %v265_v18, 0.0  ;;  %v298_v30 = vmax.f32 %v266_v19, 0.0 }
  0x22   : > { %v299_v31 = vmax.f32 %v267_v20, 0.0  ;;  %v271_v32 = vadd.f32 %v472_v1, %v232_v21  ;;  %v300_v36 = vmax.f32 %v268_v22, 0.0  ;;  %v301_v37 = vmax.f32 %v269_v23, 0.0 }
  0x23   : > { %v302_v38 = vmax.f32 %v270_v24, 0.0  ;;  %v272_v39 = vadd.f32 %v472_v1, %v233_v25  ;;  %329 = vst [vmem:[%s495_s24 + $0x80] sm:$0xff] %v297_v29  ;;  %330 = vst [vmem:[%s495_s24 + $0x88] sm:$0xff] %v298_v30  ;;  %v234_v42 = vmul.f32 %v462_v0, %v195_v26  ;;  %v235_v43 = vmul.f32 %v462_v0, %v196_v27 }
  0x24   : > { %331 = vst [vmem:[%s495_s24 + $0x90] sm:$0xff] %v299_v31  ;;  %v303_v41 = vmax.f32 %v271_v32, 0.0  ;;  %v236_v44 = vmul.f32 %v462_v0, %v197_v28  ;;  %332 = vst [vmem:[%s495_s24 + $0x98] sm:$0xff] %v300_v36  ;;  %v237_v47 = vmul.f32 %v462_v0, %v198_v33  ;;  %v238_v48 = vmul.f32 %v462_v0, %v199_v34 }
  0x25   : > { %333 = vst [vmem:[%s495_s24 + $0xa0] sm:$0xff] %v301_v37  ;;  %334 = vst [vmem:[%s495_s24 + $0xa8] sm:$0xff] %v302_v38  ;;  %v304_v46 = vmax.f32 %v272_v39, 0.0  ;;  %v239_v49 = vmul.f32 %v462_v0, %v200_v35  ;;  %v273_v50 = vadd.f32 %v472_v1, %v234_v42  ;;  %v274_v51 = vadd.f32 %v472_v1, %v235_v43 }
  0x26   : > { %335 = vst [vmem:[%s495_s24 + $0xb0] sm:$0xff] %v303_v41  ;;  %v275_v52 = vadd.f32 %v472_v1, %v236_v44  ;;  %v240_v53 = vmul.f32 %v462_v0, %v201_v40  ;;  %v276_v54 = vadd.f32 %v472_v1, %v237_v47  ;;  %v277_v55 = vadd.f32 %v472_v1, %v238_v48 }
  0x27   : > { %336 = vst [vmem:[%s495_s24 + $0xb8] sm:$0xff] %v304_v46  ;;  %v278_v56 = vadd.f32 %v472_v1, %v239_v49  ;;  %v241_v57 = vmul.f32 %v462_v0, %v202_v45  ;;  %v305_v58 = vmax.f32 %v273_v50, 0.0  ;;  %v306_v59 = vmax.f32 %v274_v51, 0.0 }
  0x28   : > { %v307_v60 = vmax.f32 %v275_v52, 0.0  ;;  %v279_v61 = vadd.f32 %v472_v1, %v240_v53  ;;  %v308_v62 = vmax.f32 %v276_v54, 0.0  ;;  %v309_v63 = vmax.f32 %v277_v55, 0.0 }
  0x29   : > { %v310_v2 = vmax.f32 %v278_v56, 0.0  ;;  %v280_v3 = vadd.f32 %v472_v1, %v241_v57  ;;  %337 = vst [vmem:[%s495_s24 + $0xc0] sm:$0xff] %v305_v58  ;;  %338 = vst [vmem:[%s495_s24 + $0xc8] sm:$0xff] %v306_v59 }
  0x2a   : > { %339 = vst [vmem:[%s495_s24 + $0xd0] sm:$0xff] %v307_v60  ;;  %v311_v4 = vmax.f32 %v279_v61, 0.0  ;;  %340 = vst [vmem:[%s495_s24 + $0xd8] sm:$0xff] %v308_v62 }
  0x2b   : > { %341 = vst [vmem:[%s495_s24 + $0xe0] sm:$0xff] %v309_v63  ;;  %342 = vst [vmem:[%s495_s24 + $0xe8] sm:$0xff] %v310_v2  ;;  %v312_v0 = vmax.f32 %v280_v3, 0.0 }
  0x2c   : > { %343 = vst [vmem:[%s495_s24 + $0xf0] sm:$0xff] %v311_v4 }
  0x2d   : > { %344 = vst [vmem:[%s495_s24 + $0xf8] sm:$0xff] %v312_v0 }
  0x2e PF: > { %s13_s12 = sadd.s32 1, %s429_s12  }
  0x2f   : > { %p10_p4 = scmp.ge.s32.totalorder %s13_s12, 4  }
  0x31   :  { %12 = sbr.rel (!%p10_p4) target bundleno = 1 (0x1), region = 62 }

// kernel: conv_bn_relu.2
= control target key start
LH: loop header
LB: loop body
LE: loop exit
PB: predicated region body
PF: predicated region fallthrough
CT: control target
= control target key end

     0   :  { %s2382_s18 = smov 0   ;;  %s3984_s0 = inlined_call_operand.vmem [shape: f32[2,18,18,4], index: 0, kind: input, shape index: {}]   ;;  %s3985_s1 = inlined_call_operand.vmem [shape: f32[36,128], index: 1, kind: input, shape index: {}]   ;;  %s3986_s2 = inlined_call_operand.vmem [shape: f32[1,128], index: 2, kind: input, shape index: {}]   ;;  %s3987_s3 = inlined_call_operand.vmem [shape: f32[2,256,128], index: 3, kind: output, shape index: {0}]   ;;  %s3988_s4 = inlined_call_operand.vmem [shape: f32[2,1,128], index: 4, kind: output, shape index: {1}]   ;;  %s3989_s5 = inlined_call_operand.vmem [shape: f32[2,1,128], index: 5, kind: output, shape index: {2}]  }
   0x1 LB: > { %s2147_s19 = sadd.s32 4294967295, %s2342_s18   ;;  %p2151_p0 = scmp.ge.s32.totalorder %s2342_s18, 1  ;;  %s2342_s18 = sphi %s2382_s18, %s16_s18  }
   0x2   : > { %p192_p1 = scmp.lt.s32.totalorder %s2342_s18, 3 }
   0x4   : > { %p193_p2 = pnand %p2151_p0, %p192_p1 }
   0x6   : > { %196 = sbr.rel (%p193_p2) target bundleno = 883 (0x373), region = 32 }
   0xd   : > { %p226_p3 = scmp.lt.s32.totalorder %s2147_s19, 1  ;;  %vm344_vm0 = vcmask 1046528   ;;  %s2344_s24 = smov 4   ;;  %vm425_vm1 = vcmask 1045504   ;;  %vm1673_vm2 = vcmask 1043456   ;;  %vm1300_vm3 = vcmask 31744  }
   0xe   : > { %s2345_s25 = smov 8   ;;  %s2346_s26 = smov 12   ;;  %vm1333_vm4 = vcmask 64512   ;;  %vm1366_vm5 = vcmask 97280   ;;  %vm1399_vm6 = vcmask 130048   ;;  %vm1432_vm7 = vcmask 162816  }
   0xf   : > { %s4202_s19 = smov (!%p226_p3, %s2147_s19), 1  ;;  %s2347_s27 = smov 16   ;;  %vm1465_vm8 = vcmask 195584   ;;  %vm1498_vm9 = vcmask 228352   ;;  %vm1531_vm10 = vcmask 261120   ;;  %vm1576_vm11 = vcmask 293888  }
  0x10   : > { %s2301_s20 = smul.u32 432, %s4202_s19  ;;  %s2348_s7 = smov 20  }
  0x11   : > { %s2349_s12 = smov 24   ;;  %s2350_s15 = smov 28  }
  0x12   : > { %s2396_s23 = scalar_lea.vmem %s3984_s0, %s2301_s20  ;;  %s2351_s16 = smov 32  }
  0x13   : > { %v2399_v0 = vld [vmem:[%s2396_s23 + $0x18] sm:$0xff]  ;;  %v2402_v1 = vld [vmem:[%s2396_s23 + $0x20] sm:$0xff]  ;;  %v2410_v5 = vld [vmem:[%s2396_s23 + $0x8] sm:$0xff]  ;;  %s2191_s17 = sshll.u32 %s4202_s19, 8  ;;  %s241_s30 = scalar_lea.vmem %s3989_s5, %s4202_s19 }
  0x14   : > { %v2405_v2 = vld [vmem:[%s2396_s23] sm:$0xff]  ;;  %v350_v3 = vrot.slane %v2399_v0, 1  ;;  %v351_v4 = vrot.slane %v2402_v1, 1  ;;  %v2414_v7 = vld [vmem:[%s2396_s23 + $0x28] sm:$0x3]  ;;  %v346_v8 = vrot.slane %v2410_v5, 1 }
  0x15   : > { %4083 = vst [vmem:[#allocation2_spill] sm:$0xff] %v2405_v2  ;;  %v345_v6 = vrot.slane %v2405_v2, 1  ;;  %v353_v9 = vrot.slane %v2414_v7, 1  ;;  %v2419_v10 = vld [vmem:[%s2396_s23 + $0x10] sm:$0x3]  ;;  %v2422_v11 = vld [vmem:[%s2396_s23 + $0x38] sm:$0xff] }
  0x16   : > { %v2425_v12 = vsel %vm344_vm0, %v350_v3, %v351_v4  ;;  %v348_v13 = vrot.slane %v2419_v10, 1  ;;  %v2429_v14 = vld [vmem:[%s2396_s23 + $0x40] sm:$0x3]  ;;  %v2432_v15 = vld [vmem:[%s2396_s23 + $0x30] sm:$0xff]  ;;  %v356_v18 = vrot.slane %v2422_v11, 1  ;;  %v2452_v24 = vld [vmem:[%s2396_s23 + $0x48] sm:$0xff] }
  0x17   : > { %536 = vrot.lane.b32.xlu1 %v2425_v12, %s2344_s24  ;;  %v347_v16 = vsel %vm344_vm0, %v345_v6, %v346_v8  ;;  %v2439_v17 = vsel %vm344_vm0, %v351_v4, %v353_v9  ;;  %v358_v19 = vrot.slane %v2429_v14, 1  ;;  %v355_v21 = vrot.slane %v2432_v15, 1  ;;  %v2446_v22 = vld [vmem:[%s2396_s23 + $0x50] sm:$0xff]  ;;  %v2449_v23 = vld [vmem:[%s2396_s23 + $0x58] sm:$0x3]  ;;  %v2467_v30 = vld [vmem:[%s2396_s23 + $0x68] sm:$0xff] }
  0x18   : > { %532 = vrot.lane.b32.xlu0 %v347_v16, %s2344_s24  ;;  %v349_v20 = vsel %vm344_vm0, %v346_v8, %v348_v13  ;;  %v361_v26 = vrot.slane %v2446_v22, 1  ;;  %v363_v27 = vrot.slane %v2449_v23, 1  ;;  %v360_v29 = vrot.slane %v2452_v24, 1  ;;  %v2470_v31 = vld [vmem:[%s2396_s23 + $0x70] sm:$0x3]  ;;  %v2473_v32 = vld [vmem:[%s2396_s23 + $0x60] sm:$0xff] }
  0x19   : > { %v2458_v25 = vsel %vm344_vm0, %v356_v18, %v358_v19  ;;  %v2463_v28 = vsel %vm344_vm0, %v355_v21, %v356_v18  ;;  %v366_v34 = vrot.slane %v2467_v30, 1  ;;  %v368_v35 = vrot.slane %v2470_v31, 1  ;;  %v2489_v38 = vld [vmem:[%s2396_s23 + $0x80] sm:$0xff]  ;;  %v2492_v39 = vld [vmem:[%s2396_s23 + $0x88] sm:$0x3]  ;;  %v2495_v40 = vld [vmem:[%s2396_s23 + $0x78] sm:$0xff] }
  0x1a   : > { %v2480_v33 = vsel %vm344_vm0, %v361_v26, %v363_v27  ;;  %v2485_v36 = vsel %vm344_vm0, %v360_v29, %v361_v26  ;;  %v365_v37 = vrot.slane %v2473_v32, 1  ;;  %v371_v42 = vrot.slane %v2489_v38, 1  ;;  %v2511_v46 = vld [vmem:[%s2396_s23 + $0x98] sm:$0xff]  ;;  %v2514_v47 = vld [vmem:[%s2396_s23 + $0xa0] sm:$0x3]  ;;  %v2517_v48 = vld [vmem:[%s2396_s23 + $0x90] sm:$0xff] }
  0x1b   : > { %538 = vrot.lane.b32.xlu1 %v2439_v17, %s2344_s24  ;;  %4084 = vst [vmem:[#allocation3_spill] sm:$0xff] %v2480_v33  ;;  %v2502_v41 = vsel %vm344_vm0, %v366_v34, %v368_v35  ;;  %v373_v43 = vrot.slane %v2492_v39, 1  ;;  %v370_v45 = vrot.slane %v2495_v40, 1  ;;  %v376_v50 = vrot.slane %v2511_v46, 1  ;;  %v2533_v54 = vld [vmem:[%s2396_s23 + $0xb0] sm:$0xff]  ;;  %v2539_v56 = vld [vmem:[%s2396_s23 + $0xa8] sm:$0xff] }
  0x1c   : > { %534 = vrot.lane.b32.xlu0 %v349_v20, %s2344_s24  ;;  %4085 = vst [vmem:[#allocation4_spill] sm:$0xff] %v2502_v41  ;;  %v2507_v44 = vsel %vm344_vm0, %v365_v37, %v366_v34  ;;  %v378_v51 = vrot.slane %v2514_v47, 1  ;;  %v375_v53 = vrot.slane %v2517_v48, 1  ;;  %v2536_v55 = vld [vmem:[%s2396_s23 + $0xb8] sm:$0x3]  ;;  %v381_v58 = vrot.slane %v2533_v54, 1 }
  0x1d   : > { %4086 = vst [vmem:[#allocation5_spill] sm:$0xff] %v2507_v44  ;;  %v2524_v49 = vsel %vm344_vm0, %v371_v42, %v373_v43  ;;  %v2529_v52 = vsel %vm344_vm0, %v370_v45, %v371_v42  ;;  %v383_v59 = vrot.slane %v2536_v55, 1  ;;  %v380_v61 = vrot.slane %v2539_v56, 1  ;;  %v2555_v62 = vld [vmem:[%s2396_s23 + $0xc8] sm:$0xff]  ;;  %v2558_v63 = vld [vmem:[%s2396_s23 + $0xd0] sm:$0x3] }
  0x1e   : > { %4087 = vst [vmem:[#allocation6_spill] sm:$0xff] %v2524_v49  ;;  %4088 = vst [vmem:[#allocation7_spill] sm:$0xff] %v2529_v52  ;;  %v2546_v57 = vsel %vm344_vm0, %v376_v50, %v378_v51  ;;  %v2551_v60 = vsel %vm344_vm0, %v375_v53, %v376_v50  ;;  %v2561_v3 = vld [vmem:[%s2396_s23 + $0xc0] sm:$0xff]  ;;  %v386_v6 = vrot.slane %v2555_v62, 1  ;;  %v388_v8 = vrot.slane %v2558_v63, 1  ;;  %v2583_v19 = vld [vmem:[%s2396_s23 + $0xd8] sm:$0xff] }
  0x1f   : > { %542 = vrot.lane.b32.xlu1 %v2458_v25, %s2344_s24  ;;  %4089 = vst [vmem:[#allocation8_spill] sm:$0xff] %v2546_v57  ;;  %4090 = vst [vmem:[#allocation9_spill] sm:$0xff] %v2551_v60  ;;  %v2568_v4 = vsel %vm344_vm0, %v381_v58, %v383_v59  ;;  %v2573_v9 = vsel %vm344_vm0, %v380_v61, %v381_v58  ;;  %v385_v13 = vrot.slane %v2561_v3, 1  ;;  %v2577_v16 = vld [vmem:[%s2396_s23 + $0xe0] sm:$0xff]  ;;  %v2580_v18 = vld [vmem:[%s2396_s23 + $0xe8] sm:$0x3] }
  0x20   : > { %540 = vrot.lane.b32.xlu0 %v2463_v28, %s2344_s24  ;;  %4091 = vst [vmem:[#allocation10_spill] sm:$0xff] %v2568_v4  ;;  %4092 = vst [vmem:[#allocation11_spill] sm:$0xff] %v2573_v9  ;;  %v2590_v20 = vsel %vm344_vm0, %v386_v6, %v388_v8  ;;  %v391_v21 = vrot.slane %v2577_v16, 1  ;;  %v393_v26 = vrot.slane %v2580_v18, 1  ;;  %v390_v29 = vrot.slane %v2583_v19, 1  ;;  %v2599_v34 = vld [vmem:[%s2396_s23 + $0xf8] sm:$0xff] }
  0x21   : > { %4093 = vst [vmem:[#allocation12_spill] sm:$0xff] %v2590_v20  ;;  %v2595_v27 = vsel %vm344_vm0, %v385_v13, %v386_v6  ;;  %v2602_v35 = vld [vmem:[%s2396_s23 + $0x100] sm:$0x3]  ;;  %v2605_v37 = vld [vmem:[%s2396_s23 + $0xf0] sm:$0xff]  ;;  %v396_v43 = vrot.slane %v2599_v34, 1  ;;  %v2627_v59 = vld [vmem:[%s2396_s23 + $0x108] sm:$0xff] }
  0x22   : > { %4094 = vst [vmem:[#allocation13_spill] sm:$0xff] %v2595_v27  ;;  %v2612_v42 = vsel %vm344_vm0, %v391_v21, %v393_v26  ;;  %v398_v45 = vrot.slane %v2602_v35, 1  ;;  %v2617_v50 = vsel %vm344_vm0, %v390_v29, %v391_v21  ;;  %v395_v51 = vrot.slane %v2605_v37, 1  ;;  %v2621_v53 = vld [vmem:[%s2396_s23 + $0x110] sm:$0xff]  ;;  %v2624_v58 = vld [vmem:[%s2396_s23 + $0x118] sm:$0x3] }
  0x23   : > { %546 = vrot.lane.b32.xlu1 %v2480_v33, %s2344_s24  ;;  %4095 = vst [vmem:[#allocation14_spill] sm:$0xff] %v2612_v42  ;;  %4096 = vst [vmem:[#allocation15_spill] sm:$0xff] %v2617_v50  ;;  %v401_v6 = vrot.slane %v2621_v53, 1  ;;  %v403_v8 = vrot.slane %v2624_v58, 1  ;;  %v400_v21 = vrot.slane %v2627_v59, 1  ;;  %v2643_v26 = vld [vmem:[%s2396_s23 + $0x128] sm:$0xff] }
  0x24   : > { %544 = vrot.lane.b32.xlu0 %v2485_v36, %s2344_s24  ;;  %v2634_v61 = vsel %vm344_vm0, %v396_v43, %v398_v45  ;;  %v2639_v13 = vsel %vm344_vm0, %v395_v51, %v396_v43  ;;  %v2646_v29 = vld [vmem:[%s2396_s23 + $0x130] sm:$0x3]  ;;  %v406_v43 = vrot.slane %v2643_v26, 1 }
  0x25   : > { %4097 = vst [vmem:[#allocation16_spill] sm:$0xff] %v2634_v61  ;;  %4098 = vst [vmem:[#allocation17_spill] sm:$0xff] %v2639_v13  ;;  %v2656_v45 = vsel %vm344_vm0, %v401_v6, %v403_v8  ;;  %v408_v51 = vrot.slane %v2646_v29, 1 }
  0x26   : > { %4099 = vst [vmem:[#allocation18_spill] sm:$0xff] %v2656_v45 }
  0x27   : > { %550 = vrot.lane.b32.xlu1 %v2502_v41, %s2344_s24  ;;  %v2678_v8 = vsel %vm344_vm0, %v406_v43, %v408_v51  ;;  %v2712_v41 = vld [vmem:[%s2396_s23 + $0x178] sm:$0x3] }
  0x28   : > { %548 = vrot.lane.b32.xlu0 %v2507_v44, %s2344_s24  ;;  %4101 = vst [vmem:[#allocation20_spill] sm:$0xff] %v2678_v8 }
  0x2b   : > { %554 = vrot.lane.b32.xlu1 %v2524_v49, %s2344_s24 }
  0x2c   : > { %552 = vrot.lane.b32.xlu0 %v2529_v52, %s2344_s24  ;;  %v2709_v52 = vld [vmem:[%s2396_s23 + $0x170] sm:$0xff] }
  0x2f   : > { %558 = vrot.lane.b32.xlu1 %v2546_v57, %s2344_s24  ;;  %v2687_v57 = vld [vmem:[%s2396_s23 + $0x158] sm:$0xff] }
  0x30   : > { %556 = vrot.lane.b32.xlu0 %v2551_v60, %s2344_s24 }
  0x33   : > { %562 = vrot.lane.b32.xlu1 %v2568_v4, %s2344_s24 }
  0x34   : > { %560 = vrot.lane.b32.xlu0 %v2573_v9, %s2344_s24 }
  0x37   : > { %566 = vrot.lane.b32.xlu1 %v2590_v20, %s2344_s24 }
  0x38   : > { %564 = vrot.lane.b32.xlu0 %v2595_v27, %s2344_s24  ;;  %v2665_v27 = vld [vmem:[%s2396_s23 + $0x140] sm:$0xff] }
  0x3b   : > { %570 = vrot.lane.b32.xlu1 %v2612_v42, %s2344_s24  ;;  %v2649_v42 = vld [vmem:[%s2396_s23 + $0x120] sm:$0xff] }
  0x3c   : > { %568 = vrot.lane.b32.xlu0 %v2617_v50, %s2344_s24  ;;  %v2661_v50 = vsel %vm344_vm0, %v400_v21, %v401_v6  ;;  %v405_v20 = vrot.slane %v2649_v42, 1  ;;  %v411_v6 = vrot.slane %v2665_v27, 1 }
  0x3d   : > { %4100 = vst [vmem:[#allocation19_spill] sm:$0xff] %v2661_v50 }
  0x3e   : > { %v2683_v4 = vsel %vm344_vm0, %v405_v20, %v406_v43  ;;  %v416_v20 = vrot.slane %v2687_v57, 1 }
  0x3f   : > { %574 = vrot.lane.b32.xlu1 %v2634_v61, %s2344_s24  ;;  %v2668_v61 = vld [vmem:[%s2396_s23 + $0x148] sm:$0x3]  ;;  %4102 = vst [vmem:[#allocation21_spill] sm:$0xff] %v2683_v4 }
  0x40   : > { %572 = vrot.lane.b32.xlu0 %v2639_v13, %s2344_s24  ;;  %v2671_v13 = vld [vmem:[%s2396_s23 + $0x138] sm:$0xff]  ;;  %v413_v21 = vrot.slane %v2668_v61, 1 }
  0x41   : > { %v410_v9 = vrot.slane %v2671_v13, 1 }
  0x42   : > { %v2700_v51 = vsel %vm344_vm0, %v411_v6, %v413_v21 }
  0x43   : > { %578 = vrot.lane.b32.xlu1 %v2656_v45, %s2344_s24  ;;  %v2690_v45 = vld [vmem:[%s2396_s23 + $0x160] sm:$0x3]  ;;  %4103 = vst [vmem:[#allocation22_spill] sm:$0xff] %v2700_v51  ;;  %v2705_v60 = vsel %vm344_vm0, %v410_v9, %v411_v6  ;;  %v421_v9 = vrot.slane %v2709_v52, 1  ;;  %v423_v6 = vrot.slane %v2712_v41, 1 }
  0x44   : > { %576 = vrot.lane.b32.xlu0 %v2661_v50, %s2344_s24  ;;  %v2693_v50 = vld [vmem:[%s2396_s23 + $0x150] sm:$0xff]  ;;  %v418_v43 = vrot.slane %v2690_v45, 1  ;;  %4104 = vst [vmem:[#allocation23_spill] sm:$0xff] %v2705_v60 }
  0x45   : > { %v415_v49 = vrot.slane %v2693_v50, 1 }
  0x46   : > { %v2722_v21 = vsel %vm344_vm0, %v416_v20, %v418_v43  ;;  %v427_v43 = vrot.slane %v2410_v5, 2  ;;  %v434_v5 = vrot.slane %v2414_v7, 2  ;;  %v436_v7 = vrot.slane %v2432_v15, 2 }
  0x47   : > { %582 = vrot.lane.b32.xlu1 %v2678_v8, %s2344_s24  ;;  %v2715_v8 = vld [vmem:[%s2396_s23 + $0x168] sm:$0xff]  ;;  %4105 = vst [vmem:[#allocation24_spill] sm:$0xff] %v2722_v21 }
  0x48   : > { %580 = vrot.lane.b32.xlu0 %v2683_v4, %s2344_s24  ;;  %v2727_v4 = vsel %vm344_vm0, %v415_v49, %v416_v20  ;;  %v420_v44 = vrot.slane %v2715_v8, 1  ;;  %v426_v49 = vrot.slane %v2405_v2, 2  ;;  %v469_v2 = vrot.slane %v2558_v63, 2 }
  0x49   : > { %4106 = vst [vmem:[#allocation25_spill] sm:$0xff] %v2727_v4 }
  0x4a   : > { %v2740_v33 = vsel %vm344_vm0, %v420_v44, %v421_v9  ;;  %v431_v44 = vrot.slane %v2399_v0, 2 }
  0x4b   : > { %586 = vrot.lane.b32.xlu1 %v2700_v51, %s2344_s24  ;;  %v2735_v51 = vsel %vm344_vm0, %v421_v9, %v423_v6  ;;  %4108 = vst [vmem:[#allocation27_spill] sm:$0xff] %v2740_v33  ;;  %v432_v6 = vrot.slane %v2402_v1, 2 }
  0x4c   : > { %584 = vrot.lane.b32.xlu0 %v2705_v60, %s2344_s24  ;;  %4107 = vst [vmem:[#allocation26_spill] sm:$0xff] %v2735_v51  ;;  %v429_v60 = vrot.slane %v2419_v10, 2  ;;  %v428_v10 = vsel %vm425_vm1, %v426_v49, %v427_v43  ;;  %v442_v49 = vrot.slane %v2446_v22, 2 }
  0x4d   : > { %v2755_v9 = vsel %vm425_vm1, %v432_v6, %v434_v5 }
  0x4e   : > { %v430_v20 = vsel %vm425_vm1, %v427_v43, %v429_v60  ;;  %v439_v60 = vrot.slane %v2429_v14, 2 }
  0x4f   : > { %590 = vrot.lane.b32.xlu1 %v2722_v21, %s2344_s24  ;;  %v459_v21 = vrot.slane %v2514_v47, 2 }
  0x50   : > { %588 = vrot.lane.b32.xlu0 %v2727_v4, %s2344_s24  ;;  %v464_v4 = vrot.slane %v2536_v55, 2 }
  0x53   : > { %594 = vrot.lane.b32.xlu1 %v2735_v51, %s2344_s24  ;;  %v437_v51 = vrot.slane %v2422_v11, 2 }
  0x54   : > { %592 = vrot.lane.b32.xlu0 %v2740_v33, %s2344_s24  ;;  %v2760_v33 = vsel %vm425_vm1, %v431_v44, %v432_v6  ;;  %v441_v6 = vrot.slane %v2452_v24, 2  ;;  %v449_v44 = vrot.slane %v2470_v31, 2  ;;  %s3812_s24 = scalar_lea.vmem %s3987_s3, %s2191_s17 }
  0x55   : > { %v2768_v43 = vsel %vm425_vm1, %v437_v51, %v439_v60  ;;  %v2773_v14 = vsel %vm425_vm1, %v436_v7, %v437_v51  ;;  %v446_v51 = vrot.slane %v2473_v32, 2  ;;  %v452_v7 = vrot.slane %v2489_v38, 2 }
  0x57   : > { %630 = vrot.lane.b32.xlu1 %v430_v20, %s2345_s25  ;;  %v444_v20 = vrot.slane %v2449_v23, 2  ;;  %v2786_v23 = vsel %vm425_vm1, %v441_v6, %v442_v49 }
  0x58   : > { %628 = vrot.lane.b32.xlu0 %v428_v10, %s2345_s25  ;;  %v447_v10 = vrot.slane %v2467_v30, 2 }
  0x59   : > { %v2781_v5 = vsel %vm425_vm1, %v442_v49, %v444_v20  ;;  %v454_v20 = vrot.slane %v2492_v39, 2  ;;  %v451_v49 = vrot.slane %v2495_v40, 2 }
  0x5a   : > { %v2794_v60 = vsel %vm425_vm1, %v447_v10, %v449_v44  ;;  %v2799_v31 = vsel %vm425_vm1, %v446_v51, %v447_v10  ;;  %v457_v44 = vrot.slane %v2511_v46, 2  ;;  %v456_v10 = vrot.slane %v2517_v48, 2 }
  0x5b   : > { %634 = vrot.lane.b32.xlu1 %v2755_v9, %s2345_s25  ;;  %v2807_v6 = vsel %vm425_vm1, %v452_v7, %v454_v20  ;;  %v2812_v39 = vsel %vm425_vm1, %v451_v49, %v452_v7  ;;  %v462_v20 = vrot.slane %v2533_v54, 2  ;;  %v461_v7 = vrot.slane %v2539_v56, 2 }
  0x5c   : > { %632 = vrot.lane.b32.xlu0 %v2760_v33, %s2345_s25  ;;  %4109 = vst [vmem:[#allocation28_spill] sm:$0xff] %v2807_v6  ;;  %v2820_v51 = vsel %vm425_vm1, %v457_v44, %v459_v21  ;;  %v2825_v47 = vsel %vm425_vm1, %v456_v10, %v457_v44  ;;  %v467_v21 = vrot.slane %v2555_v62, 2  ;;  %v466_v44 = vrot.slane %v2561_v3, 2 }
  0x5d   : > { %4110 = vst [vmem:[#allocation29_spill] sm:$0xff] %v2820_v51  ;;  %4111 = vst [vmem:[#allocation30_spill] sm:$0xff] %v2825_v47  ;;  %v2833_v49 = vsel %vm425_vm1, %v462_v20, %v464_v4  ;;  %v2838_v55 = vsel %vm425_vm1, %v461_v7, %v462_v20  ;;  %v472_v4 = vrot.slane %v2577_v16, 2  ;;  %v471_v20 = vrot.slane %v2583_v19, 2 }
  0x5e   : > { %4112 = vst [vmem:[#allocation31_spill] sm:$0xff] %v2833_v49  ;;  %4113 = vst [vmem:[#allocation32_spill] sm:$0xff] %v2838_v55  ;;  %v2846_v10 = vsel %vm425_vm1, %v467_v21, %v469_v2  ;;  %v2851_v63 = vsel %vm425_vm1, %v466_v44, %v467_v21  ;;  %v477_v2 = vrot.slane %v2599_v34, 2  ;;  %v476_v21 = vrot.slane %v2605_v37, 2 }
  0x5f   : > { %638 = vrot.lane.b32.xlu1 %v2768_v43, %s2345_s25  ;;  %4114 = vst [vmem:[#allocation33_spill] sm:$0xff] %v2846_v10  ;;  %4115 = vst [vmem:[#allocation34_spill] sm:$0xff] %v2851_v63 }
  0x60   : > { %636 = vrot.lane.b32.xlu0 %v2773_v14, %s2345_s25 }
  0x63   : > { %642 = vrot.lane.b32.xlu1 %v2781_v5, %s2345_s25 }
  0x64   : > { %640 = vrot.lane.b32.xlu0 %v2786_v23, %s2345_s25 }
  0x67   : > { %646 = vrot.lane.b32.xlu1 %v2794_v60, %s2345_s25 }
  0x68   : > { %644 = vrot.lane.b32.xlu0 %v2799_v31, %s2345_s25 }
  0x6b   : > { %650 = vrot.lane.b32.xlu1 %v2807_v6, %s2345_s25 }
  0x6c   : > { %648 = vrot.lane.b32.xlu0 %v2812_v39, %s2345_s25 }
  0x6f   : > { %654 = vrot.lane.b32.xlu1 %v2820_v51, %s2345_s25  ;;  %v474_v51 = vrot.slane %v2580_v18, 2  ;;  %v2864_v18 = vsel %vm425_vm1, %v471_v20, %v472_v4 }
  0x70   : > { %652 = vrot.lane.b32.xlu0 %v2825_v47, %s2345_s25  ;;  %4117 = vst [vmem:[#allocation36_spill] sm:$0xff] %v2864_v18 }
  0x71   : > { %v2859_v7 = vsel %vm425_vm1, %v472_v4, %v474_v51  ;;  %v482_v51 = vrot.slane %v2621_v53, 2  ;;  %v481_v4 = vrot.slane %v2627_v59, 2 }
  0x72   : > { %4116 = vst [vmem:[#allocation35_spill] sm:$0xff] %v2859_v7 }
  0x73   : > { %658 = vrot.lane.b32.xlu1 %v2833_v49, %s2345_s25  ;;  %v479_v49 = vrot.slane %v2602_v35, 2  ;;  %v2877_v35 = vsel %vm425_vm1, %v476_v21, %v477_v2 }
  0x74   : > { %656 = vrot.lane.b32.xlu0 %v2838_v55, %s2345_s25  ;;  %4119 = vst [vmem:[#allocation38_spill] sm:$0xff] %v2877_v35 }
  0x75   : > { %v2872_v44 = vsel %vm425_vm1, %v477_v2, %v479_v49  ;;  %v487_v49 = vrot.slane %v2643_v26, 2  ;;  %v486_v2 = vrot.slane %v2649_v42, 2 }
  0x76   : > { %4118 = vst [vmem:[#allocation37_spill] sm:$0xff] %v2872_v44 }
  0x77   : > { %662 = vrot.lane.b32.xlu1 %v2846_v10, %s2345_s25  ;;  %v484_v10 = vrot.slane %v2624_v58, 2  ;;  %v2890_v58 = vsel %vm425_vm1, %v481_v4, %v482_v51 }
  0x78   : > { %660 = vrot.lane.b32.xlu0 %v2851_v63, %s2345_s25  ;;  %4121 = vst [vmem:[#allocation40_spill] sm:$0xff] %v2890_v58  ;;  %v1565_v63 = vld [vmem:[%s3985_s1 + $0x8] sm:$0xff] }
  0x79   : > { %v2885_v20 = vsel %vm425_vm1, %v482_v51, %v484_v10  ;;  %v492_v10 = vrot.slane %v2665_v27, 2  ;;  %v491_v51 = vrot.slane %v2671_v13, 2 }
  0x7a   : > { %4120 = vst [vmem:[#allocation39_spill] sm:$0xff] %v2885_v20 }
  0x7b   : > { %666 = vrot.lane.b32.xlu1 %v2859_v7, %s2345_s25  ;;  %v489_v7 = vrot.slane %v2646_v29, 2  ;;  %v2903_v29 = vsel %vm425_vm1, %v486_v2, %v487_v49 }
  0x7c   : > { %664 = vrot.lane.b32.xlu0 %v2864_v18, %s2345_s25  ;;  %4123 = vst [vmem:[#allocation42_spill] sm:$0xff] %v2903_v29 }
  0x7d   : > { %v2898_v21 = vsel %vm425_vm1, %v487_v49, %v489_v7  ;;  %v497_v7 = vrot.slane %v2687_v57, 2  ;;  %v496_v49 = vrot.slane %v2693_v50, 2 }
  0x7e   : > { %4122 = vst [vmem:[#allocation41_spill] sm:$0xff] %v2898_v21 }
  0x7f   : > { %670 = vrot.lane.b32.xlu1 %v2872_v44, %s2345_s25  ;;  %v494_v44 = vrot.slane %v2668_v61, 2  ;;  %v2918_v61 = vsel %vm425_vm1, %v491_v51, %v492_v10  ;;  %v501_v51 = vrot.slane %v2715_v8, 2 }
  0x80   : > { %668 = vrot.lane.b32.xlu0 %v2877_v35, %s2345_s25  ;;  %4126 = vst [vmem:[#allocation45_spill] sm:$0xff] %v2918_v61 }
  0x81   : > { %v2911_v4 = vsel %vm425_vm1, %v492_v10, %v494_v44  ;;  %v2935_v10 = vsel %vm425_vm1, %v496_v49, %v497_v7 }
  0x82   : > { %4124 = vst [vmem:[#allocation43_spill] sm:$0xff] %v2911_v4  ;;  %4130 = vst [vmem:[#allocation49_spill] sm:$0xff] %v2935_v10 }
  0x83   : > { %674 = vrot.lane.b32.xlu1 %v2885_v20, %s2345_s25  ;;  %v499_v20 = vrot.slane %v2690_v45, 2  ;;  %v502_v45 = vrot.slane %v2709_v52, 2 }
  0x84   : > { %672 = vrot.lane.b32.xlu0 %v2890_v58, %s2345_s25 }
  0x85   : > { %v2928_v44 = vsel %vm425_vm1, %v497_v7, %v499_v20 }
  0x86   : > { %4128 = vst [vmem:[#allocation47_spill] sm:$0xff] %v2928_v44 }
  0x87   : > { %678 = vrot.lane.b32.xlu1 %v2898_v21, %s2345_s25  ;;  %v504_v21 = vrot.slane %v2712_v41, 2  ;;  %v2950_v41 = vsel %vm425_vm1, %v501_v51, %v502_v45 }
  0x88   : > { %676 = vrot.lane.b32.xlu0 %v2903_v29, %s2345_s25  ;;  %4134 = vst [vmem:[#allocation53_spill] sm:$0xff] %v2950_v41 }
  0x89   : > { %v2915_v58 = vpop.permute.xlu1 %536  ;;  %v2945_v20 = vsel %vm425_vm1, %v502_v45, %v504_v21 }
  0x8a   : > { %4125 = vst [vmem:[#allocation44_spill] sm:$0xff] %v2915_v58  ;;  %v2921_v2 = vpop.permute.xlu0 %532  ;;  %4132 = vst [vmem:[#allocation51_spill] sm:$0xff] %v2945_v20  ;;  %v1564_v58 = vld [vmem:[%s3985_s1] sm:$0xff] }
  0x8b   : > { %4127 = vst [vmem:[#allocation46_spill] sm:$0xff] %v2921_v2  ;;  %682 = vrot.lane.b32.xlu1 %v2911_v4, %s2345_s25 }
  0x8c   : > { %680 = vrot.lane.b32.xlu0 %v2918_v61, %s2345_s25 }
  0x8d   : > { %v2932_v29 = vpop.permute.xlu1 %538 }
  0x8e   : > { %4129 = vst [vmem:[#allocation48_spill] sm:$0xff] %v2932_v29  ;;  %v2938_v35 = vpop.permute.xlu0 %534 }
  0x8f   : > { %4131 = vst [vmem:[#allocation50_spill] sm:$0xff] %v2938_v35  ;;  %686 = vrot.lane.b32.xlu1 %v2928_v44, %s2345_s25  ;;  %v2287_v35 = vpack.c.bf16 %v1565_v63, %v1564_v58 }
  0x90   : > { %684 = vrot.lane.b32.xlu0 %v2935_v10, %s2345_s25 }
  0x91   : > { %v2947_v4 = vpop.permute.xlu1 %542  ;;  %2288 = vmatprep.subr.bf16.mxu0 %v2287_v35  ;;  %2295 = vmatprep.subr.bf16.mxu1 %v2287_v35 }
  0x92   : > { %4133 = vst [vmem:[#allocation52_spill] sm:$0xff] %v2947_v4  ;;  %v2952_v7 = vpop.permute.xlu0 %540  ;;  %2290 = vmatpush3.bf16.msra.mxu0 %v2287_v35  ;;  %2298 = vmatpush3.bf16.msra.mxu1 %v2287_v35 }
  0x93   : > { %4135 = vst [vmem:[#allocation54_spill] sm:$0xff] %v2952_v7  ;;  %690 = vrot.lane.b32.xlu1 %v2945_v20, %s2345_s25 }
  0x94   : > { %688 = vrot.lane.b32.xlu0 %v2950_v41, %s2345_s25 }
  0x95   : > { %v2958_v49 = vpop.permute.xlu1 %546 }
  0x96   : > { %v2960_v44 = vpop.permute.xlu0 %544 }
  0x97   : > { %4136 = vst [vmem:[#allocation55_spill] sm:$0xff] %v2960_v44  ;;  %726 = vrot.lane.b32.xlu1 %v2402_v1, %s2346_s26 }
  0x98   : > { %724 = vrot.lane.b32.xlu0 %v2399_v0, %s2346_s26 }
  0x99   : > { %v2966_v21 = vpop.permute.xlu1 %550 }
  0x9a   : > { %v2968_v45 = vpop.permute.xlu0 %548 }
  0x9b   : > { %730 = vrot.lane.b32.xlu1 %v2422_v11, %s2346_s26 }
  0x9c   : > { %728 = vrot.lane.b32.xlu0 %v2432_v15, %s2346_s26 }
  0x9d   : > { %v2974_v51 = vpop.permute.xlu1 %554 }
  0x9e   : > { %v2976_v20 = vpop.permute.xlu0 %552 }
  0x9f   : > { %734 = vrot.lane.b32.xlu1 %v2446_v22, %s2346_s26 }
  0xa0   : > { %732 = vrot.lane.b32.xlu0 %v2452_v24, %s2346_s26 }
  0xa1   : > { %v2982_v0 = vpop.permute.xlu1 %558 }
  0xa2   : > { %v2984_v1 = vpop.permute.xlu0 %556 }
  0xa3   : > { %738 = vrot.lane.b32.xlu1 %v2467_v30, %s2346_s26 }
  0xa4   : > { %736 = vrot.lane.b32.xlu0 %v2473_v32, %s2346_s26 }
  0xa5   : > { %v2990_v41 = vpop.permute.xlu1 %562 }
  0xa6   : > { %v2992_v10 = vpop.permute.xlu0 %560 }
  0xa7   : > { %742 = vrot.lane.b32.xlu1 %v2489_v38, %s2346_s26 }
  0xa8   : > { %740 = vrot.lane.b32.xlu0 %v2495_v40, %s2346_s26 }
  0xa9   : > { %v2998_v61 = vpop.permute.xlu1 %566 }
  0xaa   : > { %v3000_v44 = vpop.permute.xlu0 %564 }
  0xab   : > { %746 = vrot.lane.b32.xlu1 %v2511_v46, %s2346_s26 }
  0xac   : > { %744 = vrot.lane.b32.xlu0 %v2517_v48, %s2346_s26 }
  0xad   : > { %v3006_v4 = vpop.permute.xlu1 %570 }
  0xae   : > { %v3008_v18 = vpop.permute.xlu0 %568 }
  0xaf   : > { %750 = vrot.lane.b32.xlu1 %v2533_v54, %s2346_s26 }
  0xb0   : > { %748 = vrot.lane.b32.xlu0 %v2539_v56, %s2346_s26 }
  0xb1   : > { %v3014_v7 = vpop.permute.xlu1 %574 }
  0xb2   : > { %v3016_v29 = vpop.permute.xlu0 %572 }
  0xb3   : > { %822 = vrot.lane.b32.xlu1 %v2439_v17, %s2347_s27  ;;  %v1566_v17 = vld [vmem:[%s3985_s1 + $0x10] sm:$0xff] }
  0xb4   : > { %820 = vrot.lane.b32.xlu0 %v2425_v12, %s2347_s27  ;;  %v1567_v12 = vld [vmem:[%s3985_s1 + $0x18] sm:$0xff] }
  0xb5   : > { %v3028_v2 = vpop.permute.xlu1 %578  ;;  %v2291_v63 = vpack.c.bf16 %v1567_v12, %v1566_v17 }
  0xb6   : > { %v3030_v55 = vpop.permute.xlu0 %576 }
  0xb7   : > { %918 = vrot.lane.b32.xlu1 %v2755_v9, %s2348_s7  ;;  %2292 = vmatprep.subr.bf16.mxu0 %v2291_v63 }
  0xb8   : > { %916 = vrot.lane.b32.xlu0 %v2760_v33, %s2348_s7  ;;  %2296 = vmatprep.subr.bf16.mxu1 %v2291_v63  ;;  %v1568_v33 = vld [vmem:[%s3985_s1 + $0x20] sm:$0xf] }
  0xb9   : > { %v3042_v58 = vpop.permute.xlu1 %582  ;;  %2294 = vmatpush3.bf16.msra.mxu0 %v2291_v63  ;;  %2299 = vmatpush3.bf16.msra.mxu1 %v2291_v63 }
  0xba   : > { %v3044_v47 = vpop.permute.xlu0 %580  ;;  %2237 = vmatprep.subr.msk.mxu0 %vm1673_vm2, %v1568_v33  ;;  %2297 = vmatprep.subr.msk.mxu1 %vm1673_vm2, %v1568_v33 }
  0xbb   : > { %1014 = vrot.lane.b32.xlu1 %v2422_v11, %s2349_s12 }
  0xbc   : > { %1012 = vrot.lane.b32.xlu0 %v2432_v15, %s2349_s12 }
  0xbd   : > { %v3053_v9 = vpop.permute.xlu1 %586  ;;  %2238 = vmatpush3.msk.msra.mxu0 %vm1673_vm2, %v1568_v33  ;;  %2300 = vmatpush3.msk.msra.mxu1 %vm1673_vm2, %v1568_v33 }
  0xbe   : > { %v3055_v35 = vpop.permute.xlu0 %584 }
  0xbf   : > { %824 = vrot.lane.b32.xlu1 %v2463_v28, %s2347_s27 }
  0xc0   : > { %1108 = vrot.lane.b32.xlu0 %v2463_v28, %s2350_s15 }
  0xc1   : > { %v3061_v11 = vpop.permute.xlu1 %590 }
  0xc2   : > { %v3063_v15 = vpop.permute.xlu0 %588 }
  0xc3   : > { %1204 = vrot.lane.b32.xlu1 %v2773_v14, %s2351_s16 }
  0xc4   : > { %1110 = vrot.lane.b32.xlu0 %v2458_v25, %s2350_s15 }
  0xc5   : > { %v3069_v17 = vpop.permute.xlu1 %594 }
  0xc6   : > { %v3071_v12 = vpop.permute.xlu0 %592 }
  0xc7   : > { %920 = vrot.lane.b32.xlu1 %v2773_v14, %s2348_s7 }
  0xc8   : > { %826 = vrot.lane.b32.xlu0 %v2458_v25, %s2347_s27 }
  0xc9   : > { %v3077_v28 = vpop.permute.xlu1 %630 }
  0xca   : > { %v3079_v63 = vpop.permute.xlu0 %628 }
  0xcb   : > { %922 = vrot.lane.b32.xlu1 %v2768_v43, %s2348_s7 }
  0xcc   : > { %1206 = vrot.lane.b32.xlu0 %v2768_v43, %s2351_s16  ;;  %v1308_v43 = vsel %vm1300_vm3, %v2446_v22, %v2958_v49 }
  0xcd   : > { %v3085_v33 = vpop.permute.xlu1 %634 }
  0xce   : > { %4137 = vst [vmem:[#allocation56_spill] sm:$0xff] %v3085_v33  ;;  %v3087_v6 = vpop.permute.xlu0 %632 }
  0xcf   : > { %4138 = vst [vmem:[#allocation57_spill] sm:$0xff] %v3087_v6  ;;  %1018 = vrot.lane.b32.xlu1 %v2446_v22, %s2349_s12  ;;  %v1309_v22 = vsel %vm1300_vm3, %v2473_v32, %v2968_v45  ;;  %v1311_v45 = vsel %vm1300_vm3, %v2495_v40, %v2976_v20 }
  0xd0   : > { %1016 = vrot.lane.b32.xlu0 %v2452_v24, %s2349_s12 }
  0xd1   : > { %v3093_v25 = vpop.permute.xlu1 %638 }
  0xd2   : > { %4139 = vst [vmem:[#allocation58_spill] sm:$0xff] %v3093_v25  ;;  %v3095_v14 = vpop.permute.xlu0 %636  ;;  %v4142_v25 = vld [vmem:[#allocation3_spill] sm:$0xff] }
  0xd3   : > { %4140 = vst [vmem:[#allocation59_spill] sm:$0xff] %v3095_v14  ;;  %828 = vrot.lane.b32.xlu1 %v2485_v36, %s2347_s27 }
  0xd4   : > { %1112 = vrot.lane.b32.xlu0 %v2485_v36, %s2350_s15  ;;  %v1310_v36 = vsel %vm1300_vm3, %v2467_v30, %v2966_v21  ;;  %v1312_v21 = vsel %vm1300_vm3, %v2489_v38, %v2974_v51 }
  0xd5   : > { %v643_v33 = vpop.permute.xlu1 %642 }
  0xd6   : > { %v3105_v6 = vsel %vm1333_vm4, %v1308_v43, %v643_v33  ;;  %v3107_v24 = vpop.permute.xlu0 %640 }
  0xd7   : > { %4141 = vst [vmem:[#allocation60_spill] sm:$0xff] %v3105_v6  ;;  %1208 = vrot.lane.b32.xlu1 %v2786_v23, %s2351_s16 }
  0xd8   : > { %1114 = vrot.lane.b32.xlu0 %v4142_v25, %s2350_s15 }
  0xd9   : > { %v647_v14 = vpop.permute.xlu1 %646 }
  0xda   : > { %v3120_v49 = vsel %vm1333_vm4, %v1310_v36, %v647_v14  ;;  %v645_v33 = vpop.permute.xlu0 %644 }
  0xdb   : > { %v3123_v43 = vsel %vm1333_vm4, %v1309_v22, %v645_v33  ;;  %924 = vrot.lane.b32.xlu1 %v2786_v23, %s2348_s7  ;;  %v1314_v23 = vsel %vm1300_vm3, %v2511_v46, %v2982_v0 }
  0xdc   : > { %830 = vrot.lane.b32.xlu0 %v4142_v25, %s2347_s27 }
  0xdd   : > { %v651_v6 = vpop.permute.xlu1 %650 }
  0xde   : > { %v3136_v14 = vsel %vm1333_vm4, %v1312_v21, %v651_v6  ;;  %v649_v36 = vpop.permute.xlu0 %648  ;;  %v1313_v6 = vsel %vm1300_vm3, %v2517_v48, %v2984_v1  ;;  %v1315_v1 = vsel %vm1300_vm3, %v2539_v56, %v2992_v10  ;;  %v1317_v10 = vsel %vm1300_vm3, %v2561_v3, %v3000_v44 }
  0xdf   : > { %v3139_v22 = vsel %vm1333_vm4, %v1311_v45, %v649_v36  ;;  %926 = vrot.lane.b32.xlu1 %v2781_v5, %s2348_s7  ;;  %v1319_v44 = vsel %vm1300_vm3, %v2583_v19, %v3008_v18  ;;  %v1321_v18 = vsel %vm1300_vm3, %v2605_v37, %v3016_v29  ;;  %v1323_v37 = vsel %vm1300_vm3, %v2627_v59, %v3030_v55 }
  0xe0   : > { %1210 = vrot.lane.b32.xlu0 %v2781_v5, %s2351_s16  ;;  %v1316_v5 = vsel %vm1300_vm3, %v2533_v54, %v2990_v41  ;;  %v1325_v59 = vsel %vm1300_vm3, %v2649_v42, %v3044_v47  ;;  %v1327_v42 = vsel %vm1300_vm3, %v2671_v13, %v3055_v35  ;;  %v1329_v13 = vsel %vm1300_vm3, %v2693_v50, %v3063_v15 }
  0xe1   : > { %v655_v51 = vpop.permute.xlu1 %654  ;;  %v1331_v50 = vsel %vm1300_vm3, %v2715_v8, %v3071_v12  ;;  %v4148_v12 = vld [vmem:[#allocation9_spill] sm:$0xff] }
  0xe2   : > { %v3152_v20 = vsel %vm1333_vm4, %v1314_v23, %v655_v51  ;;  %v653_v25 = vpop.permute.xlu0 %652 }
  0xe3   : > { %v3155_v33 = vsel %vm1333_vm4, %v1313_v6, %v653_v25  ;;  %1022 = vrot.lane.b32.xlu1 %v2467_v30, %s2349_s12  ;;  %v4143_v30 = vld [vmem:[#allocation5_spill] sm:$0xff]  ;;  %v4144_v25 = vld [vmem:[#allocation4_spill] sm:$0xff] }
  0xe4   : > { %1020 = vrot.lane.b32.xlu0 %v2473_v32, %s2349_s12  ;;  %v1318_v32 = vsel %vm1300_vm3, %v2555_v62, %v2998_v61  ;;  %v1320_v61 = vsel %vm1300_vm3, %v2577_v16, %v3006_v4  ;;  %v1322_v4 = vsel %vm1300_vm3, %v2599_v34, %v3014_v7  ;;  %v1324_v34 = vsel %vm1300_vm3, %v2621_v53, %v3028_v2 }
  0xe5   : > { %v659_v0 = vpop.permute.xlu1 %658  ;;  %v1326_v53 = vsel %vm1300_vm3, %v2643_v26, %v3042_v58 }
  0xe6   : > { %v3168_v21 = vsel %vm1333_vm4, %v1316_v5, %v659_v0  ;;  %v657_v45 = vpop.permute.xlu0 %656 }
  0xe7   : > { %v3171_v36 = vsel %vm1333_vm4, %v1315_v1, %v657_v45  ;;  %832 = vrot.lane.b32.xlu1 %v4143_v30, %s2347_s27 }
  0xe8   : > { %1116 = vrot.lane.b32.xlu0 %v4143_v30, %s2350_s15 }
  0xe9   : > { %v663_v41 = vpop.permute.xlu1 %662 }
  0xea   : > { %v3184_v23 = vsel %vm1333_vm4, %v1318_v32, %v663_v41  ;;  %v661_v51 = vpop.permute.xlu0 %660 }
  0xeb   : > { %v3187_v6 = vsel %vm1333_vm4, %v1317_v10, %v661_v51  ;;  %1212 = vrot.lane.b32.xlu1 %v2799_v31, %s2351_s16 }
  0xec   : > { %1118 = vrot.lane.b32.xlu0 %v4144_v25, %s2350_s15 }
  0xed   : > { %v667_v5 = vpop.permute.xlu1 %666 }
  0xee   : > { %v3200_v0 = vsel %vm1333_vm4, %v1320_v61, %v667_v5  ;;  %v665_v1 = vpop.permute.xlu0 %664  ;;  %v4146_v5 = vld [vmem:[#allocation6_spill] sm:$0xff] }
  0xef   : > { %v3203_v45 = vsel %vm1333_vm4, %v1319_v44, %v665_v1  ;;  %928 = vrot.lane.b32.xlu1 %v2799_v31, %s2348_s7 }
  0xf0   : > { %834 = vrot.lane.b32.xlu0 %v4144_v25, %s2347_s27 }
  0xf1   : > { %v671_v30 = vpop.permute.xlu1 %670 }
  0xf2   : > { %v3216_v32 = vsel %vm1333_vm4, %v1322_v4, %v671_v30  ;;  %v669_v41 = vpop.permute.xlu0 %668 }
  0xf3   : > { %v3219_v10 = vsel %vm1333_vm4, %v1321_v18, %v669_v41  ;;  %930 = vrot.lane.b32.xlu1 %v2794_v60, %s2348_s7 }
  0xf4   : > { %1214 = vrot.lane.b32.xlu0 %v2794_v60, %s2351_s16 }
  0xf5   : > { %v675_v31 = vpop.permute.xlu1 %674 }
  0xf6   : > { %v3232_v29 = vsel %vm1333_vm4, %v1324_v34, %v675_v31  ;;  %v673_v7 = vpop.permute.xlu0 %672  ;;  %v4149_v31 = vld [vmem:[#allocation30_spill] sm:$0xff] }
  0xf7   : > { %v3235_v51 = vsel %vm1333_vm4, %v1323_v37, %v673_v7  ;;  %1026 = vrot.lane.b32.xlu1 %v2489_v38, %s2349_s12  ;;  %v4145_v38 = vld [vmem:[#allocation7_spill] sm:$0xff] }
  0xf8   : > { %1024 = vrot.lane.b32.xlu0 %v2495_v40, %s2349_s12  ;;  %v1328_v40 = vsel %vm1300_vm3, %v2665_v27, %v3053_v9  ;;  %v1330_v27 = vsel %vm1300_vm3, %v2687_v57, %v3061_v11  ;;  %v1332_v57 = vsel %vm1300_vm3, %v2709_v52, %v3069_v17 }
  0xf9   : > { %v679_v60 = vpop.permute.xlu1 %678 }
  0xfa   : > { %v3248_v55 = vsel %vm1333_vm4, %v1326_v53, %v679_v60  ;;  %v677_v2 = vpop.permute.xlu0 %676  ;;  %v4151_v60 = vld [vmem:[#allocation29_spill] sm:$0xff] }
  0xfb   : > { %v3251_v25 = vsel %vm1333_vm4, %v1325_v59, %v677_v2  ;;  %836 = vrot.lane.b32.xlu1 %v4145_v38, %s2347_s27 }
  0xfc   : > { %1120 = vrot.lane.b32.xlu0 %v4145_v38, %s2350_s15 }
  0xfd   : > { %v683_v26 = vpop.permute.xlu1 %682 }
  0xfe   : > { %v3264_v47 = vsel %vm1333_vm4, %v1328_v40, %v683_v26  ;;  %v681_v58 = vpop.permute.xlu0 %680  ;;  %v4152_v26 = vld [vmem:[#allocation11_spill] sm:$0xff] }
  0xff   : > { %v3267_v61 = vsel %vm1333_vm4, %v1327_v42, %v681_v58  ;;  %1216 = vrot.lane.b32.xlu1 %v2812_v39, %s2351_s16 }
 0x100   : > { %1122 = vrot.lane.b32.xlu0 %v4146_v5, %s2350_s15 }
 0x101   : > { %v687_v9 = vpop.permute.xlu1 %686 }
 0x102   : > { %v3280_v35 = vsel %vm1333_vm4, %v1330_v27, %v687_v9  ;;  %v685_v44 = vpop.permute.xlu0 %684 }
 0x103   : > { %v3283_v1 = vsel %vm1333_vm4, %v1329_v13, %v685_v44  ;;  %932 = vrot.lane.b32.xlu1 %v2812_v39, %s2348_s7  ;;  %v4147_v39 = vld [vmem:[#allocation28_spill] sm:$0xff]  ;;  %v4155_v44 = vld [vmem:[#allocation46_spill] sm:$0xff] }
 0x104   : > { %838 = vrot.lane.b32.xlu0 %v4146_v5, %s2347_s27  ;;  %v4153_v5 = vld [vmem:[#allocation32_spill] sm:$0xff] }
 0x105   : > { %v691_v11 = vpop.permute.xlu1 %690 }
 0x106   : > { %v3296_v15 = vsel %vm1333_vm4, %v1332_v57, %v691_v11  ;;  %v689_v4 = vpop.permute.xlu0 %688  ;;  %v4156_v57 = vld [vmem:[#allocation2_spill] sm:$0xff] }
 0x107   : > { %v3299_v30 = vsel %vm1333_vm4, %v1331_v50, %v689_v4  ;;  %934 = vrot.lane.b32.xlu1 %v4147_v39, %s2348_s7  ;;  %v1301_v11 = vsel %vm1300_vm3, %v4156_v57, %v4155_v44  ;;  %v4157_v50 = vld [vmem:[#allocation31_spill] sm:$0xff]  ;;  %v4159_v44 = vld [vmem:[#allocation50_spill] sm:$0xff] }
 0x108   : > { %1218 = vrot.lane.b32.xlu0 %v4147_v39, %s2351_s16  ;;  %v1334_v4 = vsel %vm1333_vm4, %v1301_v11, %v3079_v63 }
 0x109   : > { %v3305_v18 = vpop.permute.xlu1 %726 }
 0x10a   : > { %v725_v52 = vpop.permute.xlu0 %724 }
 0x10b   : > { %1030 = vrot.lane.b32.xlu1 %v2511_v46, %s2349_s12  ;;  %v4150_v46 = vld [vmem:[#allocation8_spill] sm:$0xff]  ;;  %v1367_v39 = vsel %vm1366_vm5, %v1334_v4, %v725_v52 }
 0x10c   : > { %1028 = vrot.lane.b32.xlu0 %v2517_v48, %s2349_s12 }
 0x10d   : > { %v3311_v8 = vpop.permute.xlu1 %730 }
 0x10e   : > { %v3313_v17 = vpop.permute.xlu0 %728 }
 0x10f   : > { %840 = vrot.lane.b32.xlu1 %v4148_v12, %s2347_s27 }
 0x110   : > { %1124 = vrot.lane.b32.xlu0 %v4148_v12, %s2350_s15 }
 0x111   : > { %v3319_v41 = vpop.permute.xlu1 %734 }
 0x112   : > { %v3321_v34 = vpop.permute.xlu0 %732 }
 0x113   : > { %1220 = vrot.lane.b32.xlu1 %v4149_v31, %s2351_s16 }
 0x114   : > { %1126 = vrot.lane.b32.xlu0 %v4150_v46, %s2350_s15 }
 0x115   : > { %v3327_v48 = vpop.permute.xlu1 %738 }
 0x116   : > { %v3329_v37 = vpop.permute.xlu0 %736 }
 0x117   : > { %936 = vrot.lane.b32.xlu1 %v4149_v31, %s2348_s7 }
 0x118   : > { %842 = vrot.lane.b32.xlu0 %v4150_v46, %s2347_s27 }
 0x119   : > { %v3335_v7 = vpop.permute.xlu1 %742 }
 0x11a   : > { %v3337_v53 = vpop.permute.xlu0 %740 }
 0x11b   : > { %938 = vrot.lane.b32.xlu1 %v4151_v60, %s2348_s7 }
 0x11c   : > { %1222 = vrot.lane.b32.xlu0 %v4151_v60, %s2351_s16 }
 0x11d   : > { %v3343_v59 = vpop.permute.xlu1 %746 }
 0x11e   : > { %v3345_v2 = vpop.permute.xlu0 %744 }
 0x11f   : > { %1034 = vrot.lane.b32.xlu1 %v2533_v54, %s2349_s12  ;;  %v4154_v54 = vld [vmem:[#allocation10_spill] sm:$0xff] }
 0x120   : > { %1032 = vrot.lane.b32.xlu0 %v2539_v56, %s2349_s12 }
 0x121   : > { %v3351_v38 = vpop.permute.xlu1 %750 }
 0x122   : > { %v3353_v40 = vpop.permute.xlu0 %748 }
 0x123   : > { %844 = vrot.lane.b32.xlu1 %v4152_v26, %s2347_s27 }
 0x124   : > { %1128 = vrot.lane.b32.xlu0 %v4152_v26, %s2350_s15 }
 0x125   : > { %v823_v42 = vpop.permute.xlu1 %822 }
 0x126   : > { %v821_v58 = vpop.permute.xlu0 %820 }
 0x127   : > { %1224 = vrot.lane.b32.xlu1 %v4153_v5, %s2351_s16  ;;  %v1400_v31 = vsel %vm1399_vm6, %v1367_v39, %v821_v58 }
 0x128   : > { %1130 = vrot.lane.b32.xlu0 %v4154_v54, %s2350_s15 }
 0x129   : > { %v919_v27 = vpop.permute.xlu1 %918 }
 0x12a   : > { %v917_v56 = vpop.permute.xlu0 %916 }
 0x12b   : > { %940 = vrot.lane.b32.xlu1 %v4153_v5, %s2348_s7  ;;  %v1433_v60 = vsel %vm1432_vm7, %v1400_v31, %v917_v56  ;;  %v2318_v56 = vld [vmem:[%s2396_s23 + $0x8] sm:$0xff] }
 0x12c   : > { %846 = vrot.lane.b32.xlu0 %v4154_v54, %s2347_s27  ;;  %v4158_v54 = vld [vmem:[#allocation13_spill] sm:$0xff]  ;;  %v1302_v57 = vsel %vm1300_vm3, %v2318_v56, %v4159_v44 }
 0x12d   : > { %v1015_v9 = vpop.permute.xlu1 %1014 }
 0x12e   : > { %v1013_v13 = vpop.permute.xlu0 %1012 }
 0x12f   : > { %942 = vrot.lane.b32.xlu1 %v4157_v50, %s2348_s7  ;;  %v1466_v63 = vsel %vm1465_vm8, %v1433_v60, %v1013_v13 }
 0x130   : > { %1226 = vrot.lane.b32.xlu0 %v4157_v50, %s2351_s16 }
 0x131   : > { %v825_v12 = vpop.permute.xlu1 %824 }
 0x132   : > { %v1109_v46 = vpop.permute.xlu0 %1108 }
 0x133   : > { %752 = vrot.lane.b32.xlu1 %v2561_v3, %s2346_s26  ;;  %v1499_v52 = vsel %vm1498_vm9, %v1466_v63, %v1109_v46  ;;  %v4160_v63 = vld [vmem:[#allocation34_spill] sm:$0xff] }
 0x134   : > { %1036 = vrot.lane.b32.xlu0 %v2561_v3, %s2349_s12  ;;  %v1335_v3 = vsel %vm1333_vm4, %v1302_v57, %v3077_v28 }
 0x135   : > { %v1205_v26 = vpop.permute.xlu1 %1204  ;;  %v1368_v11 = vsel %vm1366_vm5, %v1335_v3, %v3305_v18 }
 0x136   : > { %v1111_v5 = vpop.permute.xlu0 %1110  ;;  %v1532_v58 = vsel %vm1531_vm10, %v1499_v52, %v1205_v26  ;;  %v1401_v4 = vsel %vm1399_vm6, %v1368_v11, %v823_v42  ;;  %v4161_v42 = vld [vmem:[#allocation12_spill] sm:$0xff]  ;;  %v2319_v26 = vld [vmem:[%s2396_s23 + $0x18] sm:$0xff] }
 0x137   : > { %1132 = vrot.lane.b32.xlu1 %v4158_v54, %s2350_s15  ;;  %2239 = vmatprep.mubr.msk.f32.mxu0 %vm1576_vm11, %v1532_v58  ;;  %v1434_v39 = vsel %vm1432_vm7, %v1401_v4, %v919_v27  ;;  %v4164_v11 = vld [vmem:[#allocation33_spill] sm:$0xff] }
 0x138   : > { %1038 = vrot.lane.b32.xlu0 %v2555_v62, %s2349_s12  ;;  %v1467_v31 = vsel %vm1465_vm8, %v1434_v39, %v1015_v9 }
 0x139   : > { %v921_v13 = vpop.permute.xlu1 %920  ;;  %v1500_v28 = vsel %vm1498_vm9, %v1467_v31, %v1111_v5  ;;  %v4163_v5 = vld [vmem:[#allocation57_spill] sm:$0xff] }
 0x13a   : > { %v827_v50 = vpop.permute.xlu0 %826 }
 0x13b   : > { %848 = vrot.lane.b32.xlu1 %v4158_v54, %s2347_s27 }
 0x13c   : > { %754 = vrot.lane.b32.xlu0 %v2555_v62, %s2346_s26  ;;  %v4162_v62 = vld [vmem:[#allocation44_spill] sm:$0xff] }
 0x13d   : > { %v923_v46 = vpop.permute.xlu1 %922  ;;  %v1303_v9 = vsel %vm1300_vm3, %v2319_v26, %v4162_v62 }
 0x13e   : > { %v1207_v60 = vpop.permute.xlu0 %1206  ;;  %v1336_v58 = vsel %vm1333_vm4, %v1303_v9, %v4163_v5  ;;  %v4167_v9 = vld [vmem:[#allocation15_spill] sm:$0xff] }
 0x13f   : > { %v1533_v18 = vsel %vm1531_vm10, %v1500_v28, %v1207_v60  ;;  %1228 = vrot.lane.b32.xlu1 %v4160_v63, %s2351_s16  ;;  %v1369_v54 = vsel %vm1366_vm5, %v1336_v58, %v3313_v17 }
 0x140   : > { %1134 = vrot.lane.b32.xlu0 %v4161_v42, %s2350_s15  ;;  %2240 = vmatmul.mubr.msk.f32.vlgmr.msra.gmra.mrb[0].mxu0 %vm1576_vm11, %v1533_v18  ;;  %v1402_v44 = vsel %vm1399_vm6, %v1369_v54, %v825_v12  ;;  %v2320_v12 = vld [vmem:[%s2396_s23 + $0x20] sm:$0xff]  ;;  %v4166_v18 = vld [vmem:[#allocation56_spill] sm:$0xff] }
 0x141   : > { %v1019_v27 = vpop.permute.xlu1 %1018  ;;  %v1435_v3 = vsel %vm1432_vm7, %v1402_v44, %v921_v13  ;;  %v4165_v13 = vld [vmem:[#allocation48_spill] sm:$0xff] }
 0x142   : > { %v1017_v52 = vpop.permute.xlu0 %1016  ;;  %v1304_v60 = vsel %vm1300_vm3, %v2320_v12, %v4165_v13 }
 0x143   : > { %944 = vrot.lane.b32.xlu1 %v4160_v63, %s2348_s7  ;;  %v1468_v4 = vsel %vm1465_vm8, %v1435_v3, %v1017_v52  ;;  %v1337_v63 = vsel %vm1333_vm4, %v1304_v60, %v4166_v18  ;;  %v4168_v3 = vld [vmem:[#allocation54_spill] sm:$0xff] }
 0x144   : > { %850 = vrot.lane.b32.xlu0 %v4161_v42, %s2347_s27  ;;  %v1370_v52 = vsel %vm1366_vm5, %v1337_v63, %v3311_v8 }
 0x145   : > { %v829_v56 = vpop.permute.xlu1 %828  ;;  %v1403_v62 = vsel %vm1399_vm6, %v1370_v52, %v827_v50 }
 0x146   : > { %v1113_v57 = vpop.permute.xlu0 %1112  ;;  %v1436_v5 = vsel %vm1432_vm7, %v1403_v62, %v923_v46  ;;  %v4173_v62 = vld [vmem:[#allocation52_spill] sm:$0xff] }
 0x147   : > { %946 = vrot.lane.b32.xlu1 %v4164_v11, %s2348_s7  ;;  %v1501_v39 = vsel %vm1498_vm9, %v1468_v4, %v1113_v57  ;;  %v2321_v57 = vld [vmem:[%s2396_s23 + $0x30] sm:$0xff]  ;;  %v4170_v4 = vld [vmem:[#allocation59_spill] sm:$0xff] }
 0x148   : > { %1230 = vrot.lane.b32.xlu0 %v4164_v11, %s2351_s16  ;;  %v4169_v11 = vld [vmem:[#allocation36_spill] sm:$0xff] }
 0x149   : > { %v1209_v31 = vpop.permute.xlu1 %1208 }
 0x14a   : > { %v1534_v28 = vsel %vm1531_vm10, %v1501_v39, %v1209_v31  ;;  %v1115_v17 = vpop.permute.xlu0 %1114  ;;  %v4171_v31 = vld [vmem:[#allocation14_spill] sm:$0xff] }
 0x14b   : > { %756 = vrot.lane.b32.xlu1 %v2583_v19, %s2346_s26  ;;  %2242 = vmatprep.mubr.msk.f32.mxu0 %vm1576_vm11, %v1534_v28 }
 0x14c   : > { %1040 = vrot.lane.b32.xlu0 %v2583_v19, %s2349_s12  ;;  %v1469_v19 = vsel %vm1465_vm8, %v1436_v5, %v1019_v27  ;;  %v1305_v27 = vsel %vm1300_vm3, %v2321_v57, %v4168_v3  ;;  %v4174_v5 = vld [vmem:[#allocation58_spill] sm:$0xff]  ;;  %v2323_v57 = vld [vmem:[%s2396_s23 + $0xf0] sm:$0xff] }
 0x14d   : > { %v925_v42 = vpop.permute.xlu1 %924  ;;  %v1502_v54 = vsel %vm1498_vm9, %v1469_v19, %v1115_v17  ;;  %v1338_v39 = vsel %vm1333_vm4, %v1305_v27, %v4170_v4 }
 0x14e   : > { %v831_v26 = vpop.permute.xlu0 %830 }
 0x14f   : > { %1136 = vrot.lane.b32.xlu1 %v4167_v9, %s2350_s15 }
 0x150   : > { %1042 = vrot.lane.b32.xlu0 %v2577_v16, %s2349_s12 }
 0x151   : > { %v927_v58 = vpop.permute.xlu1 %926 }
 0x152   : > { %v1211_v44 = vpop.permute.xlu0 %1210 }
 0x153   : > { %v1535_v8 = vsel %vm1531_vm10, %v1502_v54, %v1211_v44  ;;  %852 = vrot.lane.b32.xlu1 %v4167_v9, %s2347_s27 }
 0x154   : > { %758 = vrot.lane.b32.xlu0 %v2577_v16, %s2346_s26  ;;  %2243 = vmatmul.mubr.msk.f32.gmra.mrb[2].mxu0 %vm1576_vm11, %v1535_v8  ;;  %v1371_v16 = vsel %vm1366_vm5, %v1338_v39, %v3321_v34 }
 0x155   : > { %v1023_v50 = vpop.permute.xlu1 %1022  ;;  %v1404_v17 = vsel %vm1399_vm6, %v1371_v16, %v829_v56  ;;  %v4172_v56 = vld [vmem:[#allocation35_spill] sm:$0xff] }
 0x156   : > { %v1021_v46 = vpop.permute.xlu0 %1020  ;;  %v1437_v13 = vsel %vm1432_vm7, %v1404_v17, %v925_v42  ;;  %v2322_v42 = vld [vmem:[%s2396_s23 + $0x38] sm:$0xff]  ;;  %v2325_v17 = vld [vmem:[%s2396_s23 + $0x48] sm:$0xff] }
 0x157   : > { %1232 = vrot.lane.b32.xlu1 %v4169_v11, %s2351_s16  ;;  %v1470_v60 = vsel %vm1465_vm8, %v1437_v13, %v1021_v46  ;;  %v1306_v9 = vsel %vm1300_vm3, %v2322_v42, %v4173_v62  ;;  %v4178_v62 = vld [vmem:[#allocation16_spill] sm:$0xff] }
 0x158   : > { %1138 = vrot.lane.b32.xlu0 %v4171_v31, %s2350_s15  ;;  %v1339_v19 = vsel %vm1333_vm4, %v1306_v9, %v4174_v5 }
 0x159   : > { %v833_v28 = vpop.permute.xlu1 %832  ;;  %v1372_v44 = vsel %vm1366_vm5, %v1339_v19, %v3319_v41  ;;  %v4175_v41 = vld [vmem:[#allocation17_spill] sm:$0xff]  ;;  %v4179_v19 = vld [vmem:[#allocation60_spill] sm:$0xff] }
 0x15a   : > { %v1117_v12 = vpop.permute.xlu0 %1116  ;;  %v1405_v46 = vsel %vm1399_vm6, %v1372_v44, %v831_v26  ;;  %v2324_v26 = vld [vmem:[%s2396_s23 + $0xf8] sm:$0xff] }
 0x15b   : > { %948 = vrot.lane.b32.xlu1 %v4169_v11, %s2348_s7  ;;  %v1503_v18 = vsel %vm1498_vm9, %v1470_v60, %v1117_v12  ;;  %v1438_v3 = vsel %vm1432_vm7, %v1405_v46, %v927_v58  ;;  %v4176_v12 = vld [vmem:[#allocation55_spill] sm:$0xff] }
 0x15c   : > { %854 = vrot.lane.b32.xlu0 %v4171_v31, %s2347_s27  ;;  %v1471_v27 = vsel %vm1465_vm8, %v1438_v3, %v1023_v50  ;;  %v1307_v50 = vsel %vm1300_vm3, %v2325_v17, %v4176_v12 }
 0x15d   : > { %v1213_v63 = vpop.permute.xlu1 %1212  ;;  %v1340_v13 = vsel %vm1333_vm4, %v1307_v50, %v3107_v24 }
 0x15e   : > { %v1536_v34 = vsel %vm1531_vm10, %v1503_v18, %v1213_v63  ;;  %v1119_v52 = vpop.permute.xlu0 %1118  ;;  %v1373_v60 = vsel %vm1366_vm5, %v1340_v13, %v3329_v37 }
 0x15f   : > { %950 = vrot.lane.b32.xlu1 %v4172_v56, %s2348_s7  ;;  %2245 = vmatprep.mubr.msk.f32.mxu0 %vm1576_vm11, %v1536_v34  ;;  %v1504_v4 = vsel %vm1498_vm9, %v1471_v27, %v1119_v52  ;;  %v1406_v63 = vsel %vm1399_vm6, %v1373_v60, %v833_v28 }
 0x160   : > { %1234 = vrot.lane.b32.xlu0 %v4172_v56, %s2351_s16  ;;  %v4177_v56 = vld [vmem:[#allocation38_spill] sm:$0xff] }
 0x161   : > { %v929_v54 = vpop.permute.xlu1 %928 }
 0x162   : > { %v835_v8 = vpop.permute.xlu0 %834  ;;  %v1439_v52 = vsel %vm1432_vm7, %v1406_v63, %v929_v54  ;;  %v1374_v54 = vsel %vm1366_vm5, %v4179_v19, %v3327_v48 }
 0x163   : > { %760 = vrot.lane.b32.xlu1 %v2323_v57, %s2346_s26  ;;  %v1407_v46 = vsel %vm1399_vm6, %v1374_v54, %v835_v8 }
 0x164   : > { %1044 = vrot.lane.b32.xlu0 %v2323_v57, %s2349_s12  ;;  %v4180_v57 = vld [vmem:[#allocation37_spill] sm:$0xff] }
 0x165   : > { %v931_v11 = vpop.permute.xlu1 %930 }
 0x166   : > { %v1215_v39 = vpop.permute.xlu0 %1214  ;;  %v1440_v3 = vsel %vm1432_vm7, %v1407_v46, %v931_v11  ;;  %v2328_v46 = vld [vmem:[%s2396_s23 + $0x120] sm:$0xff] }
 0x167   : > { %v1537_v31 = vsel %vm1531_vm10, %v1504_v4, %v1215_v39  ;;  %1140 = vrot.lane.b32.xlu1 %v4175_v41, %s2350_s15 }
 0x168   : > { %1046 = vrot.lane.b32.xlu0 %v2324_v26, %s2349_s12  ;;  %2246 = vmatmul.mubr.msk.f32.gmra.mrb[4].mxu0 %vm1576_vm11, %v1537_v31 }
 0x169   : > { %v1027_v16 = vpop.permute.xlu1 %1026 }
 0x16a   : > { %v1025_v58 = vpop.permute.xlu0 %1024  ;;  %v1473_v27 = vsel %vm1465_vm8, %v1440_v3, %v1027_v16  ;;  %v1375_v16 = vsel %vm1366_vm5, %v3123_v43, %v3337_v53  ;;  %v4182_v43 = vld [vmem:[#allocation40_spill] sm:$0xff]  ;;  %v4183_v53 = vld [vmem:[#allocation18_spill] sm:$0xff] }
 0x16b   : > { %856 = vrot.lane.b32.xlu1 %v4175_v41, %s2347_s27  ;;  %v1472_v42 = vsel %vm1465_vm8, %v1439_v52, %v1025_v58  ;;  %v2326_v41 = vld [vmem:[%s2396_s23 + $0x108] sm:$0xff]  ;;  %v2327_v58 = vld [vmem:[%s2396_s23 + $0x110] sm:$0xff] }
 0x16c   : > { %762 = vrot.lane.b32.xlu0 %v2324_v26, %s2346_s26  ;;  %v4181_v26 = vld [vmem:[#allocation19_spill] sm:$0xff] }
 0x16d   : > { %v837_v18 = vpop.permute.xlu1 %836 }
 0x16e   : > { %v1121_v34 = vpop.permute.xlu0 %1120  ;;  %v1408_v12 = vsel %vm1399_vm6, %v1375_v16, %v837_v18 }
 0x16f   : > { %1236 = vrot.lane.b32.xlu1 %v4177_v56, %s2351_s16  ;;  %v1505_v24 = vsel %vm1498_vm9, %v1472_v42, %v1121_v34  ;;  %v1376_v42 = vsel %vm1366_vm5, %v3120_v49, %v3335_v7  ;;  %v4184_v7 = vld [vmem:[#allocation39_spill] sm:$0xff] }
 0x170   : > { %1142 = vrot.lane.b32.xlu0 %v4178_v62, %s2350_s15 }
 0x171   : > { %v1217_v9 = vpop.permute.xlu1 %1216 }
 0x172   : > { %v1538_v5 = vsel %vm1531_vm10, %v1505_v24, %v1217_v9  ;;  %v1123_v37 = vpop.permute.xlu0 %1122 }
 0x173   : > { %952 = vrot.lane.b32.xlu1 %v4177_v56, %s2348_s7  ;;  %2248 = vmatprep.mubr.msk.f32.mxu0 %vm1576_vm11, %v1538_v5  ;;  %v1506_v39 = vsel %vm1498_vm9, %v1473_v27, %v1123_v37 }
 0x174   : > { %858 = vrot.lane.b32.xlu0 %v4178_v62, %s2347_s27 }
 0x175   : > { %v933_v28 = vpop.permute.xlu1 %932 }
 0x176   : > { %v839_v44 = vpop.permute.xlu0 %838  ;;  %v1441_v13 = vsel %vm1432_vm7, %v1408_v12, %v933_v28  ;;  %v4186_v12 = vld [vmem:[#allocation42_spill] sm:$0xff] }
 0x177   : > { %954 = vrot.lane.b32.xlu1 %v4180_v57, %s2348_s7  ;;  %v1409_v24 = vsel %vm1399_vm6, %v1376_v42, %v839_v44  ;;  %v2330_v42 = vld [vmem:[%s2396_s23 + $0x138] sm:$0xff] }
 0x178   : > { %1238 = vrot.lane.b32.xlu0 %v4180_v57, %s2351_s16  ;;  %v1377_v57 = vsel %vm1366_vm5, %v3139_v22, %v3345_v2 }
 0x179   : > { %v935_v4 = vpop.permute.xlu1 %934 }
 0x17a   : > { %v1219_v31 = vpop.permute.xlu0 %1218  ;;  %v1442_v9 = vsel %vm1432_vm7, %v1409_v24, %v935_v4 }
 0x17b   : > { %v1539_v48 = vsel %vm1531_vm10, %v1506_v39, %v1219_v31  ;;  %764 = vrot.lane.b32.xlu1 %v2326_v41, %s2346_s26  ;;  %v4185_v31 = vld [vmem:[#allocation21_spill] sm:$0xff] }
 0x17c   : > { %1048 = vrot.lane.b32.xlu0 %v2326_v41, %s2349_s12  ;;  %2249 = vmatmul.mubr.msk.f32.gmra.mrb[6].mxu0 %vm1576_vm11, %v1539_v48  ;;  %v2329_v41 = vld [vmem:[%s2396_s23 + $0x128] sm:$0xff] }
 0x17d   : > { %v1031_v8 = vpop.permute.xlu1 %1030 }
 0x17e   : > { %v1029_v11 = vpop.permute.xlu0 %1028  ;;  %v1475_v5 = vsel %vm1465_vm8, %v1442_v9, %v1031_v8 }
 0x17f   : > { %1144 = vrot.lane.b32.xlu1 %v4181_v26, %s2350_s15  ;;  %v1474_v60 = vsel %vm1465_vm8, %v1441_v13, %v1029_v11  ;;  %v4187_v13 = vld [vmem:[#allocation20_spill] sm:$0xff] }
 0x180   : > { %1050 = vrot.lane.b32.xlu0 %v2327_v58, %s2349_s12 }
 0x181   : > { %v841_v17 = vpop.permute.xlu1 %840 }
 0x182   : > { %v1125_v50 = vpop.permute.xlu0 %1124  ;;  %v1410_v27 = vsel %vm1399_vm6, %v1377_v57, %v841_v17 }
 0x183   : > { %860 = vrot.lane.b32.xlu1 %v4181_v26, %s2347_s27  ;;  %v1507_v63 = vsel %vm1498_vm9, %v1474_v60, %v1125_v50 }
 0x184   : > { %766 = vrot.lane.b32.xlu0 %v2327_v58, %s2346_s26  ;;  %v1378_v58 = vsel %vm1366_vm5, %v3136_v14, %v3343_v59 }
 0x185   : > { %v1221_v34 = vpop.permute.xlu1 %1220 }
 0x186   : > { %v1540_v52 = vsel %vm1531_vm10, %v1507_v63, %v1221_v34  ;;  %v1127_v56 = vpop.permute.xlu0 %1126 }
 0x187   : > { %1240 = vrot.lane.b32.xlu1 %v4182_v43, %s2351_s16  ;;  %2251 = vmatprep.mubr.msk.f32.mxu0 %vm1576_vm11, %v1540_v52  ;;  %v1508_v28 = vsel %vm1498_vm9, %v1475_v5, %v1127_v56 }
 0x188   : > { %1146 = vrot.lane.b32.xlu0 %v4183_v53, %s2350_s15 }
 0x189   : > { %v937_v18 = vpop.permute.xlu1 %936 }
 0x18a   : > { %v843_v62 = vpop.permute.xlu0 %842  ;;  %v1443_v39 = vsel %vm1432_vm7, %v1410_v27, %v937_v18  ;;  %v4190_v27 = vld [vmem:[#allocation45_spill] sm:$0xff] }
 0x18b   : > { %956 = vrot.lane.b32.xlu1 %v4182_v43, %s2348_s7  ;;  %v1411_v17 = vsel %vm1399_vm6, %v1378_v58, %v843_v62  ;;  %v4188_v43 = vld [vmem:[#allocation41_spill] sm:$0xff]  ;;  %v1379_v62 = vsel %vm1366_vm5, %v3155_v33, %v3353_v40  ;;  %v2332_v58 = vld [vmem:[%s2396_s23 + $0x150] sm:$0xff] }
 0x18c   : > { %862 = vrot.lane.b32.xlu0 %v4183_v53, %s2347_s27 }
 0x18d   : > { %v939_v37 = vpop.permute.xlu1 %938 }
 0x18e   : > { %v1223_v19 = vpop.permute.xlu0 %1222  ;;  %v1444_v50 = vsel %vm1432_vm7, %v1411_v17, %v939_v37 }
 0x18f   : > { %v1541_v49 = vsel %vm1531_vm10, %v1508_v28, %v1223_v19  ;;  %958 = vrot.lane.b32.xlu1 %v4184_v7, %s2348_s7  ;;  %v4189_v28 = vld [vmem:[#allocation23_spill] sm:$0xff] }
 0x190   : > { %1242 = vrot.lane.b32.xlu0 %v4184_v7, %s2351_s16  ;;  %2252 = vmatmul.mubr.msk.f32.gmra.mrb[8].mxu0 %vm1576_vm11, %v1541_v49  ;;  %v2331_v49 = vld [vmem:[%s2396_s23 + $0x140] sm:$0xff] }
 0x191   : > { %v1035_v54 = vpop.permute.xlu1 %1034 }
 0x192   : > { %v1033_v44 = vpop.permute.xlu0 %1032  ;;  %v1477_v60 = vsel %vm1465_vm8, %v1444_v50, %v1035_v54 }
 0x193   : > { %768 = vrot.lane.b32.xlu1 %v2328_v46, %s2346_s26  ;;  %v1476_v48 = vsel %vm1465_vm8, %v1443_v39, %v1033_v44  ;;  %v4191_v39 = vld [vmem:[#allocation22_spill] sm:$0xff] }
 0x194   : > { %1052 = vrot.lane.b32.xlu0 %v2328_v46, %s2349_s12  ;;  %v1380_v46 = vsel %vm1366_vm5, %v3152_v20, %v3351_v38 }
 0x195   : > { %v845_v3 = vpop.permute.xlu1 %844 }
 0x196   : > { %v1129_v4 = vpop.permute.xlu0 %1128  ;;  %v1412_v9 = vsel %vm1399_vm6, %v1379_v62, %v845_v3 }
 0x197   : > { %1148 = vrot.lane.b32.xlu1 %v4185_v31, %s2350_s15  ;;  %v1509_v8 = vsel %vm1498_vm9, %v1476_v48, %v1129_v4 }
 0x198   : > { %1054 = vrot.lane.b32.xlu0 %v2329_v41, %s2349_s12 }
 0x199   : > { %v1225_v11 = vpop.permute.xlu1 %1224 }
 0x19a   : > { %v1542_v26 = vsel %vm1531_vm10, %v1509_v8, %v1225_v11  ;;  %v1131_v22 = vpop.permute.xlu0 %1130 }
 0x19b   : > { %864 = vrot.lane.b32.xlu1 %v4185_v31, %s2347_s27  ;;  %2254 = vmatprep.mubr.msk.f32.mxu0 %vm1576_vm11, %v1542_v26  ;;  %v1510_v34 = vsel %vm1498_vm9, %v1477_v60, %v1131_v22  ;;  %v4192_v26 = vld [vmem:[#allocation43_spill] sm:$0xff]  ;;  %v4193_v60 = vld [vmem:[#allocation25_spill] sm:$0xff] }
 0x19c   : > { %770 = vrot.lane.b32.xlu0 %v2329_v41, %s2346_s26 }
 0x19d   : > { %v941_v2 = vpop.permute.xlu1 %940 }
 0x19e   : > { %v847_v16 = vpop.permute.xlu0 %846  ;;  %v1445_v37 = vsel %vm1432_vm7, %v1412_v9, %v941_v2 }
 0x19f   : > { %1244 = vrot.lane.b32.xlu1 %v4186_v12, %s2351_s16  ;;  %v1413_v3 = vsel %vm1399_vm6, %v1380_v46, %v847_v16 }
 0x1a0   : > { %1150 = vrot.lane.b32.xlu0 %v4187_v13, %s2350_s15 }
 0x1a1   : > { %v943_v63 = vpop.permute.xlu1 %942 }
 0x1a2   : > { %v1227_v52 = vpop.permute.xlu0 %1226  ;;  %v1446_v4 = vsel %vm1432_vm7, %v1413_v3, %v943_v63 }
 0x1a3   : > { %v1543_v14 = vsel %vm1531_vm10, %v1510_v34, %v1227_v52  ;;  %960 = vrot.lane.b32.xlu1 %v4186_v12, %s2348_s7  ;;  %v2333_v34 = vld [vmem:[%s2396_s23 + $0x158] sm:$0xff] }
 0x1a4   : > { %866 = vrot.lane.b32.xlu0 %v4187_v13, %s2347_s27  ;;  %2255 = vmatmul.mubr.msk.f32.gmra.mrb[10].mxu0 %vm1576_vm11, %v1543_v14 }
 0x1a5   : > { %v753_v59 = vpop.permute.xlu1 %752 }
 0x1a6   : > { %v1037_v56 = vpop.permute.xlu0 %1036  ;;  %v1381_v16 = vsel %vm1366_vm5, %v3171_v36, %v753_v59 }
 0x1a7   : > { %962 = vrot.lane.b32.xlu1 %v4188_v43, %s2348_s7  ;;  %v1478_v19 = vsel %vm1465_vm8, %v1445_v37, %v1037_v56 }
 0x1a8   : > { %1246 = vrot.lane.b32.xlu0 %v4188_v43, %s2351_s16 }
 0x1a9   : > { %v1133_v53 = vpop.permute.xlu1 %1132 }
 0x1aa   : > { %v1039_v18 = vpop.permute.xlu0 %1038  ;;  %v1511_v7 = vsel %vm1498_vm9, %v1478_v19, %v1133_v53 }
 0x1ab   : > { %772 = vrot.lane.b32.xlu1 %v2330_v42, %s2346_s26  ;;  %v1479_v31 = vsel %vm1465_vm8, %v1446_v4, %v1039_v18  ;;  %v4197_v4 = vld [vmem:[#allocation27_spill] sm:$0xff] }
 0x1ac   : > { %1056 = vrot.lane.b32.xlu0 %v2330_v42, %s2349_s12  ;;  %v4194_v42 = vld [vmem:[#allocation49_spill] sm:$0xff] }
 0x1ad   : > { %v849_v24 = vpop.permute.xlu1 %848 }
 0x1ae   : > { %v755_v5 = vpop.permute.xlu0 %754  ;;  %v1414_v12 = vsel %vm1399_vm6, %v1381_v16, %v849_v24  ;;  %v4195_v24 = vld [vmem:[#allocation24_spill] sm:$0xff] }
 0x1af   : > { %1152 = vrot.lane.b32.xlu1 %v4189_v28, %s2350_s15  ;;  %v1382_v43 = vsel %vm1366_vm5, %v3168_v21, %v755_v5 }
 0x1b0   : > { %1058 = vrot.lane.b32.xlu0 %v2331_v49, %s2349_s12 }
 0x1b1   : > { %v1229_v54 = vpop.permute.xlu1 %1228 }
 0x1b2   : > { %v1544_v44 = vsel %vm1531_vm10, %v1511_v7, %v1229_v54  ;;  %v1135_v33 = vpop.permute.xlu0 %1134  ;;  %v4196_v7 = vld [vmem:[#allocation47_spill] sm:$0xff] }
 0x1b3   : > { %868 = vrot.lane.b32.xlu1 %v4189_v28, %s2347_s27  ;;  %2257 = vmatprep.mubr.msk.f32.mxu0 %vm1576_vm11, %v1544_v44  ;;  %v1512_v41 = vsel %vm1498_vm9, %v1479_v31, %v1135_v33  ;;  %v2334_v33 = vld [vmem:[%s2396_s23 + $0x168] sm:$0xff]  ;;  %v2335_v31 = vld [vmem:[%s2396_s23 + $0x170] sm:$0xff] }
 0x1b4   : > { %774 = vrot.lane.b32.xlu0 %v2331_v49, %s2346_s26 }
 0x1b5   : > { %v945_v40 = vpop.permute.xlu1 %944 }
 0x1b6   : > { %v851_v57 = vpop.permute.xlu0 %850  ;;  %v1447_v13 = vsel %vm1432_vm7, %v1414_v12, %v945_v40 }
 0x1b7   : > { %1248 = vrot.lane.b32.xlu1 %v4190_v27, %s2351_s16  ;;  %v1415_v18 = vsel %vm1399_vm6, %v1382_v43, %v851_v57 }
 0x1b8   : > { %1154 = vrot.lane.b32.xlu0 %v4191_v39, %s2350_s15 }
 0x1b9   : > { %v947_v48 = vpop.permute.xlu1 %946 }
 0x1ba   : > { %v1231_v8 = vpop.permute.xlu0 %1230  ;;  %v1448_v62 = vsel %vm1432_vm7, %v1415_v18, %v947_v48 }
 0x1bb   : > { %v1545_v20 = vsel %vm1531_vm10, %v1512_v41, %v1231_v8  ;;  %964 = vrot.lane.b32.xlu1 %v4190_v27, %s2348_s7 }
 0x1bc   : > { %870 = vrot.lane.b32.xlu0 %v4191_v39, %s2347_s27  ;;  %2258 = vmatmul.mubr.msk.f32.gmra.mrb[12].mxu0 %vm1576_vm11, %v1545_v20 }
 0x1bd   : > { %v757_v38 = vpop.permute.xlu1 %756 }
 0x1be   : > { %v1041_v11 = vpop.permute.xlu0 %1040  ;;  %v1383_v40 = vsel %vm1366_vm5, %v3187_v6, %v757_v38 }
 0x1bf   : > { %966 = vrot.lane.b32.xlu1 %v4192_v26, %s2348_s7  ;;  %v1480_v63 = vsel %vm1465_vm8, %v1447_v13, %v1041_v11 }
 0x1c0   : > { %1250 = vrot.lane.b32.xlu0 %v4192_v26, %s2351_s16 }
 0x1c1   : > { %v1137_v22 = vpop.permute.xlu1 %1136 }
 0x1c2   : > { %v1043_v2 = vpop.permute.xlu0 %1042  ;;  %v1513_v52 = vsel %vm1498_vm9, %v1480_v63, %v1137_v22  ;;  %v4198_v22 = vld [vmem:[#allocation53_spill] sm:$0xff]  ;;  %v291_v63 = vld [vmem:[%s2396_s23 + $0x188] sm:$0xff] }
 0x1c3   : > { %776 = vrot.lane.b32.xlu1 %v2332_v58, %s2346_s26  ;;  %v1481_v9 = vsel %vm1465_vm8, %v1448_v62, %v1043_v2 }
 0x1c4   : > { %1060 = vrot.lane.b32.xlu0 %v2332_v58, %s2349_s12  ;;  %v4199_v58 = vld [vmem:[#allocation26_spill] sm:$0xff] }
 0x1c5   : > { %v853_v17 = vpop.permute.xlu1 %852 }
 0x1c6   : > { %v759_v50 = vpop.permute.xlu0 %758  ;;  %v1416_v57 = vsel %vm1399_vm6, %v1383_v40, %v853_v17 }
 0x1c7   : > { %1156 = vrot.lane.b32.xlu1 %v4193_v60, %s2350_s15  ;;  %v1384_v38 = vsel %vm1366_vm5, %v3184_v23, %v759_v50 }
 0x1c8   : > { %1062 = vrot.lane.b32.xlu0 %v2333_v34, %s2349_s12 }
 0x1c9   : > { %v1233_v14 = vpop.permute.xlu1 %1232 }
 0x1ca   : > { %v1546_v56 = vsel %vm1531_vm10, %v1513_v52, %v1233_v14  ;;  %v1139_v36 = vpop.permute.xlu0 %1138  ;;  %v4200_v52 = vld [vmem:[#allocation51_spill] sm:$0xff] }
 0x1cb   : > { %872 = vrot.lane.b32.xlu1 %v4193_v60, %s2347_s27  ;;  %2260 = vmatprep.mubr.msk.f32.mxu0 %vm1576_vm11, %v1546_v56  ;;  %v1514_v28 = vsel %vm1498_vm9, %v1481_v9, %v1139_v36  ;;  %v290_v60 = vld [vmem:[%s2396_s23 + $0x180] sm:$0xff]  ;;  %v510_v56 = vrot.slane %v291_v63, 1 }
 0x1cc   : > { %778 = vrot.lane.b32.xlu0 %v2333_v34, %s2346_s26  ;;  %v509_v14 = vrot.slane %v290_v60, 1 }
 0x1cd   : > { %v949_v59 = vpop.permute.xlu1 %948 }
 0x1ce   : > { %v855_v53 = vpop.permute.xlu0 %854  ;;  %v1449_v27 = vsel %vm1432_vm7, %v1416_v57, %v949_v59  ;;  %v511_v43 = vsel %vm344_vm0, %v509_v14, %v510_v56 }
 0x1cf   : > { %1252 = vrot.lane.b32.xlu1 %v4194_v42, %s2351_s16  ;;  %v1417_v26 = vsel %vm1399_vm6, %v1384_v38, %v855_v53 }
 0x1d0   : > { %1158 = vrot.lane.b32.xlu0 %v4195_v24, %s2350_s15 }
 0x1d1   : > { %v951_v37 = vpop.permute.xlu1 %950 }
 0x1d2   : > { %v1235_v19 = vpop.permute.xlu0 %1234  ;;  %v1450_v2 = vsel %vm1432_vm7, %v1417_v26, %v951_v37 }
 0x1d3   : > { %v1547_v21 = vsel %vm1531_vm10, %v1514_v28, %v1235_v19  ;;  %968 = vrot.lane.b32.xlu1 %v4194_v42, %s2348_s7  ;;  %v514_v28 = vrot.slane %v290_v60, 2  ;;  %v515_v19 = vrot.slane %v291_v63, 2 }
 0x1d4   : > { %874 = vrot.lane.b32.xlu0 %v4195_v24, %s2347_s27  ;;  %2261 = vmatmul.mubr.msk.f32.gmra.mrb[14].mxu0 %vm1576_vm11, %v1547_v21  ;;  %v292_v24 = vld [vmem:[%s2396_s23 + $0x190] sm:$0x3] }
 0x1d5   : > { %v761_v5 = vpop.permute.xlu1 %760 }
 0x1d6   : > { %v1045_v49 = vpop.permute.xlu0 %1044  ;;  %v1385_v53 = vsel %vm1366_vm5, %v3203_v45, %v761_v5  ;;  %v512_v45 = vrot.slane %v292_v24, 1 }
 0x1d7   : > { %970 = vrot.lane.b32.xlu1 %v4196_v7, %s2348_s7  ;;  %v1482_v39 = vsel %vm1465_vm8, %v1449_v27, %v1045_v49 }
 0x1d8   : > { %1254 = vrot.lane.b32.xlu0 %v4196_v7, %s2351_s16 }
 0x1d9   : > { %v1141_v54 = vpop.permute.xlu1 %1140 }
 0x1da   : > { %v1047_v44 = vpop.permute.xlu0 %1046  ;;  %v1515_v48 = vsel %vm1498_vm9, %v1482_v39, %v1141_v54  ;;  %v516_v54 = vsel %vm425_vm1, %v514_v28, %v515_v19 }
 0x1db   : > { %780 = vrot.lane.b32.xlu1 %v2334_v33, %s2346_s26  ;;  %v1483_v16 = vsel %vm1465_vm8, %v1450_v2, %v1047_v44 }
 0x1dc   : > { %1064 = vrot.lane.b32.xlu0 %v2334_v33, %s2349_s12  ;;  %v513_v33 = vsel %vm344_vm0, %v510_v56, %v512_v45 }
 0x1dd   : > { %v857_v46 = vpop.permute.xlu1 %856 }
 0x1de   : > { %v3704_v3 = vpop.permute.xlu0 %762  ;;  %v1418_v42 = vsel %vm1399_vm6, %v1385_v53, %v857_v46 }
 0x1df   : > { %1160 = vrot.lane.b32.xlu1 %v4197_v4, %s2350_s15  ;;  %v1386_v40 = vsel %vm1366_vm5, %v3200_v0, %v3704_v3 }
 0x1e0   : > { %1066 = vrot.lane.b32.xlu0 %v2335_v31, %s2349_s12 }
 0x1e1   : > { %v1237_v41 = vpop.permute.xlu1 %1236 }
 0x1e2   : > { %v1143_v8 = vpop.permute.xlu0 %1142  ;;  %v1548_v6 = vsel %vm1531_vm10, %v1515_v48, %v1237_v41 }
 0x1e3   : > { %876 = vrot.lane.b32.xlu1 %v4197_v4, %s2347_s27  ;;  %2263 = vmatprep.mubr.msk.f32.mxu1 %vm1576_vm11, %v1548_v6  ;;  %v1516_v12 = vsel %vm1498_vm9, %v1483_v16, %v1143_v8  ;;  %v517_v4 = vrot.slane %v292_v24, 2  ;;  %v294_v6 = vld [vmem:[%s2396_s23 + $0x1a0] sm:$0xff] }
 0x1e4   : > { %782 = vrot.lane.b32.xlu0 %v2335_v31, %s2346_s26  ;;  %v523_v26 = vrot.slane %v294_v6, 1 }
 0x1e5   : > { %v953_v20 = vpop.permute.xlu1 %952  ;;  %v518_v41 = vsel %vm425_vm1, %v515_v19, %v517_v4 }
 0x1e6   : > { %v859_v11 = vpop.permute.xlu0 %858  ;;  %v1451_v9 = vsel %vm1432_vm7, %v1418_v42, %v953_v20  ;;  %v295_v20 = vld [vmem:[%s2396_s23 + $0x1a8] sm:$0x3] }
 0x1e7   : > { %1256 = vrot.lane.b32.xlu1 %v4198_v22, %s2351_s16  ;;  %v1419_v57 = vsel %vm1399_vm6, %v1386_v40, %v859_v11  ;;  %v293_v11 = vld [vmem:[%s2396_s23 + $0x198] sm:$0xff] }
 0x1e8   : > { %1162 = vrot.lane.b32.xlu0 %v4199_v58, %s2350_s15 }
 0x1e9   : > { %v955_v17 = vpop.permute.xlu1 %954 }
 0x1ea   : > { %v1239_v13 = vpop.permute.xlu0 %1238  ;;  %v1452_v27 = vsel %vm1432_vm7, %v1419_v57, %v955_v17  ;;  %v528_v17 = vrot.slane %v294_v6, 2 }
 0x1eb   : > { %v1549_v23 = vsel %vm1531_vm10, %v1516_v12, %v1239_v13  ;;  %972 = vrot.lane.b32.xlu1 %v4198_v22, %s2348_s7  ;;  %v525_v22 = vrot.slane %v295_v20, 1  ;;  %v530_v13 = vrot.slane %v295_v20, 2 }
 0x1ec   : > { %878 = vrot.lane.b32.xlu0 %v4199_v58, %s2347_s27  ;;  %2264 = vmatmul.mubr.msk.f32.vlgmr.msra.gmra.mrb[0].mxu1 %vm1576_vm11, %v1549_v23  ;;  %v522_v58 = vrot.slane %v293_v11, 1 }
 0x1ed   : > { %v3734_v50 = vpop.permute.xlu1 %764  ;;  %v526_v12 = vsel %vm344_vm0, %v523_v26, %v525_v22 }
 0x1ee   : > { %v1049_v34 = vpop.permute.xlu0 %1048  ;;  %v1387_v23 = vsel %vm1366_vm5, %v3219_v10, %v3734_v50 }
 0x1ef   : > { %974 = vrot.lane.b32.xlu1 %v4200_v52, %s2348_s7  ;;  %v1484_v37 = vsel %vm1465_vm8, %v1451_v9, %v1049_v34  ;;  %v524_v34 = vsel %vm344_vm0, %v522_v58, %v523_v26 }
 0x1f0   : > { %1258 = vrot.lane.b32.xlu0 %v4200_v52, %s2351_s16 }
 0x1f1   : > { %v1145_v36 = vpop.permute.xlu1 %1144 }
 0x1f2   : > { %v1051_v59 = vpop.permute.xlu0 %1050  ;;  %v1517_v21 = vsel %vm1498_vm9, %v1484_v37, %v1145_v36 }
 0x1f3   : > { %784 = vrot.lane.b32.xlu1 %v290_v60, %s2346_s26  ;;  %v1485_v39 = vsel %vm1465_vm8, %v1452_v27, %v1051_v59  ;;  %v531_v59 = vsel %vm425_vm1, %v528_v17, %v530_v13 }
 0x1f4   : > { %1068 = vrot.lane.b32.xlu0 %v290_v60, %s2349_s12  ;;  %v527_v60 = vrot.slane %v293_v11, 2 }
 0x1f5   : > { %v861_v18 = vpop.permute.xlu1 %860 }
 0x1f6   : > { %v3748_v62 = vpop.permute.xlu0 %766  ;;  %v1420_v52 = vsel %vm1399_vm6, %v1387_v23, %v861_v18  ;;  %v529_v53 = vsel %vm425_vm1, %v527_v60, %v528_v17 }
 0x1f7   : > { %1164 = vrot.lane.b32.xlu1 %v511_v43, %s2350_s15 }
 0x1f8   : > { %1070 = vrot.lane.b32.xlu0 %v291_v63, %s2349_s12 }
 0x1f9   : > { %v1241_v49 = vpop.permute.xlu1 %1240 }
 0x1fa   : > { %v1550_v5 = vsel %vm1531_vm10, %v1517_v21, %v1241_v49  ;;  %v1147_v7 = vpop.permute.xlu0 %1146  ;;  %v1388_v21 = vsel %vm1366_vm5, %v3216_v32, %v3748_v62 }
 0x1fb   : > { %880 = vrot.lane.b32.xlu1 %v511_v43, %s2347_s27  ;;  %2266 = vmatprep.mubr.msk.f32.mxu1 %vm1576_vm11, %v1550_v5  ;;  %v1518_v48 = vsel %vm1498_vm9, %v1485_v39, %v1147_v7  ;;  %v3805_v43 = vld [vmem:[%s3986_s2] ss:$0 sm:$0xff] }
 0x1fc   : > { %786 = vrot.lane.b32.xlu0 %v291_v63, %s2346_s26 }
 0x1fd   : > { %v957_v44 = vpop.permute.xlu1 %956 }
 0x1fe   : > { %v3765_v46 = vpop.permute.xlu0 %862  ;;  %v1453_v56 = vsel %vm1432_vm7, %v1420_v52, %v957_v44 }
 0x1ff   : > { %1260 = vrot.lane.b32.xlu1 %v516_v54, %s2351_s16  ;;  %v1421_v5 = vsel %vm1399_vm6, %v1388_v21, %v3765_v46 }
 0x200   : > { %1166 = vrot.lane.b32.xlu0 %v513_v33, %s2350_s15 }
 0x201   : > { %v959_v31 = vpop.permute.xlu1 %958 }
 0x202   : > { %v1243_v0 = vpop.permute.xlu0 %1242  ;;  %v1454_v44 = vsel %vm1432_vm7, %v1421_v5, %v959_v31 }
 0x203   : > { %v1551_v3 = vsel %vm1531_vm10, %v1518_v48, %v1243_v0  ;;  %976 = vrot.lane.b32.xlu1 %v516_v54, %s2348_s7 }
 0x204   : > { %882 = vrot.lane.b32.xlu0 %v513_v33, %s2347_s27  ;;  %2267 = vmatmul.mubr.msk.f32.gmra.mrb[2].mxu1 %vm1576_vm11, %v1551_v3  ;;  %s238_s27 = scalar_lea.vmem %s3988_s4, %s4202_s19 }
 0x205   : > { %v3778_v8 = vpop.permute.xlu1 %768 }
 0x206   : > { %v1053_v38 = vpop.permute.xlu0 %1052  ;;  %v1389_v31 = vsel %vm1366_vm5, %v3235_v51, %v3778_v8 }
 0x207   : > { %978 = vrot.lane.b32.xlu1 %v518_v41, %s2348_s7  ;;  %v1486_v36 = vsel %vm1465_vm8, %v1453_v56, %v1053_v38 }
 0x208   : > { %1262 = vrot.lane.b32.xlu0 %v518_v41, %s2351_s16 }
 0x209   : > { %v1149_v2 = vpop.permute.xlu1 %1148 }
 0x20a   : > { %v1055_v16 = vpop.permute.xlu0 %1054  ;;  %v1519_v10 = vsel %vm1498_vm9, %v1486_v36, %v1149_v2 }
 0x20b   : > { %1074 = vrot.lane.b32.xlu1 %v294_v6, %s2349_s12  ;;  %v1487_v33 = vsel %vm1465_vm8, %v1454_v44, %v1055_v16 }
 0x20c   : > { %1072 = vrot.lane.b32.xlu0 %v293_v11, %s2349_s12 }
 0x20d   : > { %v865_v63 = vpop.permute.xlu1 %864 }
 0x20e   : > { %v3793_v14 = vpop.permute.xlu0 %770  ;;  %v1422_v3 = vsel %vm1399_vm6, %v1389_v31, %v865_v63 }
 0x20f   : > { %1170 = vrot.lane.b32.xlu1 %v526_v12, %s2350_s15  ;;  %v1390_v63 = vsel %vm1366_vm5, %v3232_v29, %v3793_v14 }
 0x210   : > { %1168 = vrot.lane.b32.xlu0 %v524_v34, %s2350_s15 }
 0x211   : > { %v1245_v50 = vpop.permute.xlu1 %1244 }
 0x212   : > { %v1552_v18 = vsel %vm1531_vm10, %v1519_v10, %v1245_v50  ;;  %v1151_v42 = vpop.permute.xlu0 %1150 }
 0x213   : > { %v2241_v24 = vpop.f32.mrb[0].mxu0  ;;  %1266 = vrot.lane.b32.xlu1 %v531_v59, %s2351_s16  ;;  %2269 = vmatprep.mubr.msk.f32.mxu1 %vm1576_vm11, %v1552_v18  ;;  %v1520_v27 = vsel %vm1498_vm9, %v1487_v33, %v1151_v42 }
 0x214   : > { %v1749_v9 = vadd.f32 %v2241_v24, %v3805_v43  ;;  %v1743_v37 = vpop.f32.mrb[1].mxu0  ;;  %1264 = vrot.lane.b32.xlu0 %v529_v53, %s2351_s16 }
 0x215   : > { %v1744_v28 = vadd.f32 %v3805_v43, %v1743_v37  ;;  %v961_v19 = vpop.permute.xlu1 %960 }
 0x216   : > { %1903 = vst [vmem:[%s3812_s24 + $0x8] sm:$0xff] %v1749_v9  ;;  %v1973_v49 = vmul.f32 %v1749_v9, %v1749_v9  ;;  %v867_v45 = vpop.permute.xlu0 %866  ;;  %v1455_v6 = vsel %vm1432_vm7, %v1422_v3, %v961_v19 }
 0x217   : > { %1902 = vst [vmem:[%s3812_s24] sm:$0xff] %v1744_v28  ;;  %v1934_v7 = vadd.f32 %v1749_v9, %v1744_v28  ;;  %v1972_v54 = vmul.f32 %v1744_v28, %v1744_v28  ;;  %v1423_v52 = vsel %vm1399_vm6, %v1390_v63, %v867_v45 }
 0x219   : > { %v2004_v40 = vadd.f32 %v1973_v49, %v1972_v54  ;;  %v963_v57 = vpop.permute.xlu1 %962 }
 0x21a   : > { %v1247_v4 = vpop.permute.xlu0 %1246  ;;  %v1456_v36 = vsel %vm1432_vm7, %v1423_v52, %v963_v57 }
 0x21b   : > { %v1553_v32 = vsel %vm1531_vm10, %v1520_v27, %v1247_v4 }
 0x21c   : > { %2270 = vmatmul.mubr.msk.f32.gmra.mrb[4].mxu1 %vm1576_vm11, %v1553_v32 }
 0x21d   : > { %v773_v62 = vpop.permute.xlu1 %772 }
 0x21e   : > { %v1057_v39 = vpop.permute.xlu0 %1056  ;;  %v1391_v19 = vsel %vm1366_vm5, %v3251_v25, %v773_v62 }
 0x21f   : > { %v1488_v38 = vsel %vm1465_vm8, %v1455_v6, %v1057_v39 }
 0x221   : > { %v1153_v46 = vpop.permute.xlu1 %1152 }
 0x222   : > { %v1059_v48 = vpop.permute.xlu0 %1058  ;;  %v1521_v22 = vsel %vm1498_vm9, %v1488_v38, %v1153_v46 }
 0x223   : > { %v1489_v59 = vsel %vm1465_vm8, %v1456_v36, %v1059_v48 }
 0x225   : > { %v869_v0 = vpop.permute.xlu1 %868 }
 0x226   : > { %v775_v41 = vpop.permute.xlu0 %774  ;;  %v1424_v45 = vsel %vm1399_vm6, %v1391_v19, %v869_v0 }
 0x227   : > { %v2244_v20 = vpop.f32.mrb[2].mxu0  ;;  %v1392_v48 = vsel %vm1366_vm5, %v3248_v55, %v775_v41 }
 0x228   : > { %v1759_v11 = vadd.f32 %v2244_v20, %v3805_v43  ;;  %v1753_v26 = vpop.f32.mrb[3].mxu0 }
 0x229   : > { %v1754_v2 = vadd.f32 %v3805_v43, %v1753_v26  ;;  %v1249_v58 = vpop.permute.xlu1 %1248 }
 0x22a   : > { %1905 = vst [vmem:[%s3812_s24 + $0x18] sm:$0xff] %v1759_v11  ;;  %v1554_v51 = vsel %vm1531_vm10, %v1521_v22, %v1249_v58  ;;  %v1155_v8 = vpop.permute.xlu0 %1154  ;;  %v1975_v12 = vmul.f32 %v1759_v11, %v1759_v11 }
 0x22b   : > { %1904 = vst [vmem:[%s3812_s24 + $0x10] sm:$0xff] %v1754_v2  ;;  %v1935_v16 = vadd.f32 %v1934_v7, %v1754_v2  ;;  %v1974_v17 = vmul.f32 %v1754_v2, %v1754_v2  ;;  %2272 = vmatprep.mubr.msk.f32.mxu1 %vm1576_vm11, %v1554_v51  ;;  %v1522_v50 = vsel %vm1498_vm9, %v1489_v59, %v1155_v8 }
 0x22d   : > { %v2005_v13 = vadd.f32 %v2004_v40, %v1974_v17  ;;  %v965_v23 = vpop.permute.xlu1 %964  ;;  %v1936_v60 = vadd.f32 %v1935_v16, %v1759_v11 }
 0x22e   : > { %v871_v34 = vpop.permute.xlu0 %870  ;;  %v1457_v7 = vsel %vm1432_vm7, %v1424_v45, %v965_v23 }
 0x22f   : > { %v2006_v56 = vadd.f32 %v2005_v13, %v1975_v12  ;;  %v1425_v0 = vsel %vm1399_vm6, %v1392_v48, %v871_v34 }
 0x231   : > { %v967_v10 = vpop.permute.xlu1 %966 }
 0x232   : > { %v1251_v53 = vpop.permute.xlu0 %1250  ;;  %v1458_v3 = vsel %vm1432_vm7, %v1425_v0, %v967_v10 }
 0x233   : > { %v1555_v18 = vsel %vm1531_vm10, %v1522_v50, %v1251_v53 }
 0x234   : > { %2273 = vmatmul.mubr.msk.f32.gmra.mrb[6].mxu1 %vm1576_vm11, %v1555_v18 }
 0x235   : > { %v777_v42 = vpop.permute.xlu1 %776 }
 0x236   : > { %v1061_v29 = vpop.permute.xlu0 %1060  ;;  %v1393_v13 = vsel %vm1366_vm5, %v3267_v61, %v777_v42 }
 0x237   : > { %v1490_v33 = vsel %vm1465_vm8, %v1457_v7, %v1061_v29 }
 0x239   : > { %v1157_v14 = vpop.permute.xlu1 %1156 }
 0x23a   : > { %v1063_v24 = vpop.permute.xlu0 %1062  ;;  %v1523_v40 = vsel %vm1498_vm9, %v1490_v33, %v1157_v14 }
 0x23b   : > { %v2247_v9 = vpop.f32.mrb[4].mxu0  ;;  %v1491_v6 = vsel %vm1465_vm8, %v1458_v3, %v1063_v24 }
 0x23c   : > { %v1769_v37 = vadd.f32 %v2247_v9, %v3805_v43  ;;  %v1763_v28 = vpop.f32.mrb[5].mxu0 }
 0x23d   : > { %v1764_v21 = vadd.f32 %v3805_v43, %v1763_v28  ;;  %v873_v49 = vpop.permute.xlu1 %872 }
 0x23e   : > { %1907 = vst [vmem:[%s3812_s24 + $0x28] sm:$0xff] %v1769_v37  ;;  %v779_v5 = vpop.permute.xlu0 %778  ;;  %v1977_v57 = vmul.f32 %v1769_v37, %v1769_v37  ;;  %v1426_v52 = vsel %vm1399_vm6, %v1393_v13, %v873_v49 }
 0x23f   : > { %1906 = vst [vmem:[%s3812_s24 + $0x20] sm:$0xff] %v1764_v21  ;;  %v1937_v54 = vadd.f32 %v1936_v60, %v1764_v21  ;;  %v1976_v44 = vmul.f32 %v1764_v21, %v1764_v21  ;;  %v1394_v42 = vsel %vm1366_vm5, %v3264_v47, %v779_v5 }
 0x241   : > { %v2007_v27 = vadd.f32 %v2006_v56, %v1976_v44  ;;  %v1253_v4 = vpop.permute.xlu1 %1252  ;;  %v1938_v25 = vadd.f32 %v1937_v54, %v1769_v37 }
 0x242   : > { %v1556_v32 = vsel %vm1531_vm10, %v1523_v40, %v1253_v4  ;;  %v1159_v62 = vpop.permute.xlu0 %1158 }
 0x243   : > { %2275 = vmatprep.mubr.msk.f32.mxu1 %vm1576_vm11, %v1556_v32  ;;  %v2008_v39 = vadd.f32 %v2007_v27, %v1977_v57  ;;  %v1524_v38 = vsel %vm1498_vm9, %v1491_v6, %v1159_v62 }
 0x245   : > { %v969_v46 = vpop.permute.xlu1 %968 }
 0x246   : > { %v875_v31 = vpop.permute.xlu0 %874  ;;  %v1459_v36 = vsel %vm1432_vm7, %v1426_v52, %v969_v46 }
 0x247   : > { %v1427_v24 = vsel %vm1399_vm6, %v1394_v42, %v875_v31 }
 0x249   : > { %v971_v20 = vpop.permute.xlu1 %970 }
 0x24a   : > { %v1255_v11 = vpop.permute.xlu0 %1254  ;;  %v1460_v9 = vsel %vm1432_vm7, %v1427_v24, %v971_v20 }
 0x24b   : > { %v1557_v26 = vsel %vm1531_vm10, %v1524_v38, %v1255_v11 }
 0x24c   : > { %2276 = vmatmul.mubr.msk.f32.gmra.mrb[8].mxu1 %vm1576_vm11, %v1557_v26 }
 0x24d   : > { %v781_v22 = vpop.permute.xlu1 %780 }
 0x24e   : > { %v1065_v2 = vpop.permute.xlu0 %1064 }
 0x24f   : > { %v2250_v55 = vpop.f32.mrb[6].mxu0  ;;  %v1492_v10 = vsel %vm1465_vm8, %v1459_v36, %v1065_v2 }
 0x250   : > { %v1779_v41 = vadd.f32 %v2250_v55, %v3805_v43  ;;  %v1773_v58 = vpop.f32.mrb[7].mxu0 }
 0x251   : > { %v1774_v51 = vadd.f32 %v3805_v43, %v1773_v58  ;;  %v1161_v8 = vpop.permute.xlu1 %1160 }
 0x252   : > { %1909 = vst [vmem:[%s3812_s24 + $0x38] sm:$0xff] %v1779_v41  ;;  %v1067_v16 = vpop.permute.xlu0 %1066  ;;  %v1979_v23 = vmul.f32 %v1779_v41, %v1779_v41  ;;  %v1525_v50 = vsel %vm1498_vm9, %v1492_v10, %v1161_v8 }
 0x253   : > { %1908 = vst [vmem:[%s3812_s24 + $0x30] sm:$0xff] %v1774_v51  ;;  %v1939_v17 = vadd.f32 %v1938_v25, %v1774_v51  ;;  %v1978_v12 = vmul.f32 %v1774_v51, %v1774_v51  ;;  %v1493_v37 = vsel %vm1465_vm8, %v1460_v9, %v1067_v16 }
 0x255   : > { %v2009_v60 = vadd.f32 %v2008_v39, %v1978_v12  ;;  %v877_v63 = vpop.permute.xlu1 %876  ;;  %v1940_v34 = vadd.f32 %v1939_v17, %v1779_v41  ;;  %v1395_v39 = vsel %vm1366_vm5, %v3283_v1, %v781_v22 }
 0x256   : > { %v783_v56 = vpop.permute.xlu0 %782  ;;  %v1428_v48 = vsel %vm1399_vm6, %v1395_v39, %v877_v63 }
 0x257   : > { %v2010_v59 = vadd.f32 %v2009_v60, %v1979_v23  ;;  %v1396_v1 = vsel %vm1366_vm5, %v3280_v35, %v783_v56 }
 0x259   : > { %v1257_v53 = vpop.permute.xlu1 %1256 }
 0x25a   : > { %v1558_v18 = vsel %vm1531_vm10, %v1525_v50, %v1257_v53  ;;  %v1163_v29 = vpop.permute.xlu0 %1162 }
 0x25b   : > { %2278 = vmatprep.mubr.msk.f32.mxu1 %vm1576_vm11, %v1558_v18  ;;  %v1526_v19 = vsel %vm1498_vm9, %v1493_v37, %v1163_v29 }
 0x25d   : > { %v973_v61 = vpop.permute.xlu1 %972 }
 0x25e   : > { %v879_v14 = vpop.permute.xlu0 %878  ;;  %v1461_v0 = vsel %vm1432_vm7, %v1428_v48, %v973_v61 }
 0x25f   : > { %v1429_v2 = vsel %vm1399_vm6, %v1396_v1, %v879_v14 }
 0x261   : > { %v975_v28 = vpop.permute.xlu1 %974 }
 0x262   : > { %v1259_v21 = vpop.permute.xlu0 %1258  ;;  %v1462_v41 = vsel %vm1432_vm7, %v1429_v2, %v975_v28 }
 0x263   : > { %v1559_v49 = vsel %vm1531_vm10, %v1526_v19, %v1259_v21  ;;  %v2253_v45 = vpop.f32.mrb[8].mxu0 }
 0x264   : > { %v1789_v7 = vadd.f32 %v2253_v45, %v3805_v43  ;;  %v1783_v54 = vpop.f32.mrb[9].mxu0  ;;  %2279 = vmatmul.mubr.msk.f32.gmra.mrb[10].mxu1 %vm1576_vm11, %v1559_v49 }
 0x265   : > { %v1784_v47 = vadd.f32 %v3805_v43, %v1783_v54  ;;  %v785_v5 = vpop.permute.xlu1 %784 }
 0x266   : > { %1911 = vst [vmem:[%s3812_s24 + $0x48] sm:$0xff] %v1789_v7  ;;  %v1069_v44 = vpop.permute.xlu0 %1068  ;;  %v1981_v57 = vmul.f32 %v1789_v7, %v1789_v7  ;;  %v1397_v53 = vsel %vm1366_vm5, %v3299_v30, %v785_v5 }
 0x267   : > { %1910 = vst [vmem:[%s3812_s24 + $0x40] sm:$0xff] %v1784_v47  ;;  %v1941_v33 = vadd.f32 %v1940_v34, %v1784_v47  ;;  %v1980_v40 = vmul.f32 %v1784_v47, %v1784_v47  ;;  %v1494_v3 = vsel %vm1465_vm8, %v1461_v0, %v1069_v44 }
 0x269   : > { %v2011_v27 = vadd.f32 %v2010_v59, %v1980_v40  ;;  %v1165_v4 = vpop.permute.xlu1 %1164  ;;  %v1942_v25 = vadd.f32 %v1941_v33, %v1789_v7 }
 0x26a   : > { %v1071_v32 = vpop.permute.xlu0 %1070  ;;  %v1527_v6 = vsel %vm1498_vm9, %v1494_v3, %v1165_v4 }
 0x26b   : > { %v2012_v62 = vadd.f32 %v2011_v27, %v1981_v57  ;;  %v1495_v8 = vsel %vm1465_vm8, %v1462_v41, %v1071_v32 }
 0x26d   : > { %v881_v46 = vpop.permute.xlu1 %880 }
 0x26e   : > { %v787_v31 = vpop.permute.xlu0 %786  ;;  %v1430_v61 = vsel %vm1399_vm6, %v1397_v53, %v881_v46 }
 0x26f   : > { %v1398_v10 = vsel %vm1366_vm5, %v3296_v15, %v787_v31 }
 0x271   : > { %v1261_v20 = vpop.permute.xlu1 %1260 }
 0x272   : > { %v1560_v38 = vsel %vm1531_vm10, %v1527_v6, %v1261_v20  ;;  %v1167_v11 = vpop.permute.xlu0 %1166 }
 0x273   : > { %2281 = vmatprep.mubr.msk.f32.mxu1 %vm1576_vm11, %v1560_v38  ;;  %v1528_v12 = vsel %vm1498_vm9, %v1495_v8, %v1167_v11 }
 0x275   : > { %v977_v26 = vpop.permute.xlu1 %976 }
 0x276   : > { %v883_v22 = vpop.permute.xlu0 %882  ;;  %v1463_v14 = vsel %vm1432_vm7, %v1430_v61, %v977_v26 }
 0x277   : > { %v2256_v55 = vpop.f32.mrb[10].mxu0  ;;  %v1431_v18 = vsel %vm1399_vm6, %v1398_v10, %v883_v22 }
 0x278   : > { %v1799_v58 = vadd.f32 %v2256_v55, %v3805_v43  ;;  %v1793_v51 = vpop.f32.mrb[11].mxu0 }
 0x279   : > { %v1794_v16 = vadd.f32 %v3805_v43, %v1793_v51  ;;  %v979_v17 = vpop.permute.xlu1 %978 }
 0x27a   : > { %1913 = vst [vmem:[%s3812_s24 + $0x58] sm:$0xff] %v1799_v58  ;;  %v1263_v13 = vpop.permute.xlu0 %1262  ;;  %v1983_v63 = vmul.f32 %v1799_v58, %v1799_v58  ;;  %v1464_v42 = vsel %vm1432_vm7, %v1431_v18, %v979_v17 }
 0x27b   : > { %1912 = vst [vmem:[%s3812_s24 + $0x50] sm:$0xff] %v1794_v16  ;;  %v1943_v35 = vadd.f32 %v1942_v25, %v1794_v16  ;;  %v1982_v23 = vmul.f32 %v1794_v16, %v1794_v16  ;;  %v1561_v60 = vsel %vm1531_vm10, %v1528_v12, %v1263_v13 }
 0x27c   : > { %2282 = vmatmul.mubr.msk.f32.gmra.mrb[12].mxu1 %vm1576_vm11, %v1561_v60 }
 0x27d   : > { %v2013_v34 = vadd.f32 %v2012_v62, %v1982_v23  ;;  %v1075_v52 = vpop.permute.xlu1 %1074  ;;  %v1944_v56 = vadd.f32 %v1943_v35, %v1799_v58 }
 0x27e   : > { %v1073_v36 = vpop.permute.xlu0 %1072  ;;  %v1497_v24 = vsel %vm1465_vm8, %v1464_v42, %v1075_v52 }
 0x27f   : > { %v2014_v59 = vadd.f32 %v2013_v34, %v1983_v63  ;;  %v1496_v9 = vsel %vm1465_vm8, %v1463_v14, %v1073_v36 }
 0x281   : > { %v1171_v50 = vpop.permute.xlu1 %1170 }
 0x282   : > { %v1169_v29 = vpop.permute.xlu0 %1168  ;;  %v1530_v15 = vsel %vm1498_vm9, %v1497_v24, %v1171_v50 }
 0x283   : > { %v1529_v30 = vsel %vm1498_vm9, %v1496_v9, %v1169_v29 }
 0x285   : > { %v1267_v37 = vpop.permute.xlu1 %1266 }
 0x286   : > { %v1563_v28 = vsel %vm1531_vm10, %v1530_v15, %v1267_v37  ;;  %v1265_v19 = vpop.permute.xlu0 %1264 }
 0x287   : > { %v1562_v21 = vsel %vm1531_vm10, %v1529_v30, %v1265_v19 }
 0x288   : > { %2284 = vmatprep.mubr.msk.f32.mxu1 %vm1576_vm11, %v1562_v21 }
 0x289   : > { %2285 = vmatmul.mubr.msk.f32.gmra.mrb[14].mxu1 %vm1576_vm11, %v1563_v28 }
 0x28f   : > { %v2259_v49 = vpop.f32.mrb[12].mxu0 }
 0x290   : > { %v1809_v45 = vadd.f32 %v2259_v49, %v3805_v43  ;;  %v1803_v7 = vpop.f32.mrb[13].mxu0 }
 0x291   : > { %v1804_v54 = vadd.f32 %v3805_v43, %v1803_v7 }
 0x292   : > { %1915 = vst [vmem:[%s3812_s24 + $0x68] sm:$0xff] %v1809_v45  ;;  %v1985_v44 = vmul.f32 %v1809_v45, %v1809_v45 }
 0x293   : > { %1914 = vst [vmem:[%s3812_s24 + $0x60] sm:$0xff] %v1804_v54  ;;  %v1945_v47 = vadd.f32 %v1944_v56, %v1804_v54  ;;  %v1984_v5 = vmul.f32 %v1804_v54, %v1804_v54 }
 0x295   : > { %v2015_v33 = vadd.f32 %v2014_v59, %v1984_v5  ;;  %v1946_v40 = vadd.f32 %v1945_v47, %v1809_v45 }
 0x297   : > { %v2016_v57 = vadd.f32 %v2015_v33, %v1985_v44 }
 0x2a7   : > { %v2262_v27 = vpop.f32.mrb[14].mxu0 }
 0x2a8   : > { %v1819_v4 = vadd.f32 %v2262_v27, %v3805_v43  ;;  %v1813_v25 = vpop.f32.mrb[15].mxu0 }
 0x2a9   : > { %v1814_v32 = vadd.f32 %v3805_v43, %v1813_v25 }
 0x2aa   : > { %1917 = vst [vmem:[%s3812_s24 + $0x78] sm:$0xff] %v1819_v4  ;;  %v1987_v46 = vmul.f32 %v1819_v4, %v1819_v4 }
 0x2ab   : > { %1916 = vst [vmem:[%s3812_s24 + $0x70] sm:$0xff] %v1814_v32  ;;  %v1947_v62 = vadd.f32 %v1946_v40, %v1814_v32  ;;  %v1986_v39 = vmul.f32 %v1814_v32, %v1814_v32 }
 0x2ad   : > { %v2017_v48 = vadd.f32 %v2016_v57, %v1986_v39  ;;  %v1948_v31 = vadd.f32 %v1947_v62, %v1819_v4 }
 0x2af   : > { %v2018_v0 = vadd.f32 %v2017_v48, %v1987_v46 }
 0x2bf   : > { %v2265_v3 = vpop.f32.mrb[0].mxu1 }
 0x2c0   : > { %v1829_v6 = vadd.f32 %v2265_v3, %v3805_v43  ;;  %v1823_v20 = vpop.f32.mrb[1].mxu1 }
 0x2c1   : > { %v1824_v38 = vadd.f32 %v3805_v43, %v1823_v20 }
 0x2c2   : > { %1919 = vst [vmem:[%s3812_s24 + $0x88] sm:$0xff] %v1829_v6  ;;  %v1989_v1 = vmul.f32 %v1829_v6, %v1829_v6 }
 0x2c3   : > { %1918 = vst [vmem:[%s3812_s24 + $0x80] sm:$0xff] %v1824_v38  ;;  %v1949_v11 = vadd.f32 %v1948_v31, %v1824_v38  ;;  %v1988_v26 = vmul.f32 %v1824_v38, %v1824_v38 }
 0x2c5   : > { %v2019_v22 = vadd.f32 %v2018_v0, %v1988_v26  ;;  %v1950_v2 = vadd.f32 %v1949_v11, %v1829_v6 }
 0x2c7   : > { %v2020_v55 = vadd.f32 %v2019_v22, %v1989_v1 }
 0x2d7   : > { %v2268_v41 = vpop.f32.mrb[2].mxu1 }
 0x2d8   : > { %v1839_v58 = vadd.f32 %v2268_v41, %v3805_v43  ;;  %v1833_v51 = vpop.f32.mrb[3].mxu1 }
 0x2d9   : > { %v1834_v8 = vadd.f32 %v3805_v43, %v1833_v51 }
 0x2da   : > { %1921 = vst [vmem:[%s3812_s24 + $0x98] sm:$0xff] %v1839_v58  ;;  %v1991_v12 = vmul.f32 %v1839_v58, %v1839_v58 }
 0x2db   : > { %1920 = vst [vmem:[%s3812_s24 + $0x90] sm:$0xff] %v1834_v8  ;;  %v1951_v16 = vadd.f32 %v1950_v2, %v1834_v8  ;;  %v1990_v17 = vmul.f32 %v1834_v8, %v1834_v8 }
 0x2dd   : > { %v2021_v13 = vadd.f32 %v2020_v55, %v1990_v17  ;;  %v1952_v35 = vadd.f32 %v1951_v16, %v1839_v58 }
 0x2df   : > { %v2022_v23 = vadd.f32 %v2021_v13, %v1991_v12 }
 0x2ef   : > { %v2271_v60 = vpop.f32.mrb[4].mxu1 }
 0x2f0   : > { %v1849_v63 = vadd.f32 %v2271_v60, %v3805_v43  ;;  %v1843_v34 = vpop.f32.mrb[5].mxu1 }
 0x2f1   : > { %v1844_v52 = vadd.f32 %v3805_v43, %v1843_v34 }
 0x2f2   : > { %1923 = vst [vmem:[%s3812_s24 + $0xa8] sm:$0xff] %v1849_v63  ;;  %v1993_v59 = vmul.f32 %v1849_v63, %v1849_v63 }
 0x2f3   : > { %1922 = vst [vmem:[%s3812_s24 + $0xa0] sm:$0xff] %v1844_v52  ;;  %v1953_v56 = vadd.f32 %v1952_v35, %v1844_v52  ;;  %v1992_v36 = vmul.f32 %v1844_v52, %v1844_v52 }
 0x2f5   : > { %v2023_v10 = vadd.f32 %v2022_v23, %v1992_v36  ;;  %v1954_v50 = vadd.f32 %v1953_v56, %v1849_v63 }
 0x2f7   : > { %v2024_v53 = vadd.f32 %v2023_v10, %v1993_v59 }
 0x307   : > { %v2274_v18 = vpop.f32.mrb[6].mxu1 }
 0x308   : > { %v1859_v29 = vadd.f32 %v2274_v18, %v3805_v43  ;;  %v1853_v61 = vpop.f32.mrb[7].mxu1 }
 0x309   : > { %v1854_v42 = vadd.f32 %v3805_v43, %v1853_v61 }
 0x30a   : > { %1925 = vst [vmem:[%s3812_s24 + $0xb8] sm:$0xff] %v1859_v29  ;;  %v1995_v9 = vmul.f32 %v1859_v29, %v1859_v29 }
 0x30b   : > { %1924 = vst [vmem:[%s3812_s24 + $0xb0] sm:$0xff] %v1854_v42  ;;  %v1955_v14 = vadd.f32 %v1954_v50, %v1854_v42  ;;  %v1994_v24 = vmul.f32 %v1854_v42, %v1854_v42 }
 0x30d   : > { %v2025_v15 = vadd.f32 %v2024_v53, %v1994_v24  ;;  %v1956_v37 = vadd.f32 %v1955_v14, %v1859_v29 }
 0x30f   : > { %v2026_v30 = vadd.f32 %v2025_v15, %v1995_v9 }
 0x31f   : > { %v2277_v28 = vpop.f32.mrb[8].mxu1 }
 0x320   : > { %v1869_v19 = vadd.f32 %v2277_v28, %v3805_v43  ;;  %v1863_v21 = vpop.f32.mrb[9].mxu1 }
 0x321   : > { %v1864_v49 = vadd.f32 %v3805_v43, %v1863_v21 }
 0x322   : > { %1927 = vst [vmem:[%s3812_s24 + $0xc8] sm:$0xff] %v1869_v19  ;;  %v1997_v54 = vmul.f32 %v1869_v19, %v1869_v19 }
 0x323   : > { %1926 = vst [vmem:[%s3812_s24 + $0xc0] sm:$0xff] %v1864_v49  ;;  %v1957_v45 = vadd.f32 %v1956_v37, %v1864_v49  ;;  %v1996_v7 = vmul.f32 %v1864_v49, %v1864_v49 }
 0x325   : > { %v2027_v47 = vadd.f32 %v2026_v30, %v1996_v7  ;;  %v1958_v5 = vadd.f32 %v1957_v45, %v1869_v19 }
 0x327   : > { %v2028_v44 = vadd.f32 %v2027_v47, %v1997_v54 }
 0x337   : > { %v2280_v33 = vpop.f32.mrb[10].mxu1 }
 0x338   : > { %v1879_v40 = vadd.f32 %v2280_v33, %v3805_v43  ;;  %v1873_v57 = vpop.f32.mrb[11].mxu1 }
 0x339   : > { %v1874_v27 = vadd.f32 %v3805_v43, %v1873_v57 }
 0x33a   : > { %1929 = vst [vmem:[%s3812_s24 + $0xd8] sm:$0xff] %v1879_v40  ;;  %v1999_v32 = vmul.f32 %v1879_v40, %v1879_v40 }
 0x33b   : > { %1928 = vst [vmem:[%s3812_s24 + $0xd0] sm:$0xff] %v1874_v27  ;;  %v1959_v4 = vadd.f32 %v1958_v5, %v1874_v27  ;;  %v1998_v25 = vmul.f32 %v1874_v27, %v1874_v27 }
 0x33d   : > { %v2029_v62 = vadd.f32 %v2028_v44, %v1998_v25  ;;  %v1960_v39 = vadd.f32 %v1959_v4, %v1879_v40 }
 0x33f   : > { %v2030_v46 = vadd.f32 %v2029_v62, %v1999_v32 }
 0x34f   : > { %v2283_v48 = vpop.f32.mrb[12].mxu1 }
 0x350   : > { %v1889_v31 = vadd.f32 %v2283_v48, %v3805_v43  ;;  %v1883_v0 = vpop.f32.mrb[13].mxu1 }
 0x351   : > { %v1884_v3 = vadd.f32 %v3805_v43, %v1883_v0 }
 0x352   : > { %1931 = vst [vmem:[%s3812_s24 + $0xe8] sm:$0xff] %v1889_v31  ;;  %v2001_v38 = vmul.f32 %v1889_v31, %v1889_v31 }
 0x353   : > { %1930 = vst [vmem:[%s3812_s24 + $0xe0] sm:$0xff] %v1884_v3  ;;  %v1961_v6 = vadd.f32 %v1960_v39, %v1884_v3  ;;  %v2000_v20 = vmul.f32 %v1884_v3, %v1884_v3 }
 0x355   : > { %v2031_v11 = vadd.f32 %v2030_v46, %v2000_v20  ;;  %v1962_v26 = vadd.f32 %v1961_v6, %v1889_v31 }
 0x357   : > { %v2032_v1 = vadd.f32 %v2031_v11, %v2001_v38 }
 0x35c   : > { %v2286_v22 = vpop.f32.mrb[14].mxu1 }
 0x35d   : > { %v1899_v2 = vadd.f32 %v2286_v22, %v3805_v43  ;;  %v1893_v55 = vpop.f32.mrb[15].mxu1 }
 0x35e   : > { %v1894_v41 = vadd.f32 %v3805_v43, %v1893_v55 }
 0x35f   : > { %1933 = vst [vmem:[%s3812_s24 + $0xf8] sm:$0xff] %v1899_v2  ;;  %v2003_v8 = vmul.f32 %v1899_v2, %v1899_v2 }
 0x360   : > { %1932 = vst [vmem:[%s3812_s24 + $0xf0] sm:$0xff] %v1894_v41  ;;  %v1963_v58 = vadd.f32 %v1962_v26, %v1894_v41  ;;  %v2002_v51 = vmul.f32 %v1894_v41, %v1894_v41 }
 0x362   : > { %v1964_v16 = vadd.f32 %v1963_v58, %v1899_v2  ;;  %v2033_v17 = vadd.f32 %v2032_v1, %v2002_v51 }
 0x364   : > { %v1965_v12 = vrot.slane %v1964_v16, 4  ;;  %v2034_v13 = vadd.f32 %v2033_v17, %v2003_v8 }
 0x366   : > { %v1966_v35 = vadd.f32 %v1965_v12, %v1964_v16  ;;  %v2035_v23 = vrot.slane %v2034_v13, 4 }
 0x368   : > { %v1967_v60 = vrot.slane %v1966_v35, 2  ;;  %v2036_v63 = vadd.f32 %v2035_v23, %v2034_v13 }
 0x36a   : > { %v1968_v34 = vadd.f32 %v1967_v60, %v1966_v35  ;;  %v2037_v52 = vrot.slane %v2036_v63, 2 }
 0x36c   : > { %v1969_v56 = vrot.slane %v1968_v34, 1  ;;  %v2038_v36 = vadd.f32 %v2037_v52, %v2036_v63 }
 0x36e   : > { %v1970_v43 = vadd.f32 %v1969_v56, %v1968_v34  ;;  %v2039_v59 = vrot.slane %v2038_v36, 1 }
 0x370   : > { %1971 = vst [vmem:[%s238_s27] sm:$0x1] %v1970_v43  ;;  %v2040_v10 = vadd.f32 %v2039_v59, %v2038_v36 }
 0x372   : > { %2041 = vst [vmem:[%s241_s30] sm:$0x1] %v2040_v10 }
 0x373 PF: > { %s16_s18 = sadd.s32 1, %s2342_s18  }
 0x374   : > { %p13_p4 = scmp.ge.s32.totalorder %s16_s18, 4  }
 0x376   :  { %15 = sbr.rel (!%p13_p4) target bundleno = 1 (0x1), region = 86 }

</bundles_post_ra>
